<compile_context>
chip_gen: v6e
topology: v6e:2x2x1
jax: 0.10.0
libtpu: 0.0.40
codegen_flags: <defaults>
</compile_context>

<pallas_src>
import jax
import jax.numpy as jnp
from jax import lax
from jax.experimental import pallas as pl
from jax.experimental.pallas import tpu as pltpu


_PQ = 49                      # 7*7 conv2 output positions per image
_PQ_PAD = 56                  # padded to a multiple of 8 (sublane alignment)
_K1 = 81                      # 9 conv2 taps x 9 conv1 taps
_K1_PAD = 128                 # lane-aligned patch width
_N1 = 288                     # 9 conv2 taps x 32 conv1 channels
_C2 = 64                      # conv2 output channels
_C2_PAD = 128                 # lane-dense conv output width
_KLIN = _PQ_PAD * _C2_PAD     # 7168: linear K after folding both paddings

_VMEM_LIMIT = 32 * 1024 * 1024


# ----------------------------- Pallas kernels ------------------------------

def _conv_stack_kernel(x_ref, w1b_ref, w2b_ref, o_ref, h1_ref):
    """Fused conv1+ReLU+conv2+ReLU for one batch tile.

    x_ref:   (M, 128)  bf16 input patch-column table (M = tile_batch * 56)
    w1b_ref: (128, 288) bf16 block-diagonal conv1 weight (9 shifted copies)
    w2b_ref: (288, 128) bf16 conv2 weight (im2col layout, N zero-padded)
    o_ref:   (M, 128)  bf16 ReLU'd conv2 output (rows = b*56 + p*7 + q)
    h1_ref:  (M, 288)  bf16 VMEM scratch: conv1 activations (never hit HBM)
    """
    h1 = jnp.dot(x_ref[...], w1b_ref[...], preferred_element_type=jnp.float32)
    h1_ref[...] = jnp.maximum(h1, 0.0).astype(jnp.bfloat16)
    h2 = jnp.dot(h1_ref[...], w2b_ref[...], preferred_element_type=jnp.float32)
    o_ref[...] = jnp.maximum(h2, 0.0).astype(jnp.bfloat16)


def _linear_kernel(x_ref, w_ref, b_ref, o_ref):
    # (M, 7168) bf16 @ (7168, 128) bf16 + bias; lane-dense -> unmasked stores.
    acc = jnp.dot(x_ref[...], w_ref[...], preferred_element_type=jnp.float32)
    o_ref[...] = acc + b_ref[...]


# ------------------------------ call wrappers -------------------------------

def _conv_batch_tile(batch):
    # Target ~32 images (1792 rows, ~0.5 GFLOP) per grid step; for smaller
    # batches split into 2 parallel steps so v7x's second TensorCore has work.
    if batch >= 64:
        return 32
    if batch >= 2:
        return (batch + 1) // 2
    return 1


def _linear_batch_tile(batch):
    # Multiples of 8 rows (sublane-aligned blocks), up to 128 rows per step,
    # keeping >=2 grid steps when the batch allows it.
    if batch < 16 or batch % 8 != 0:
        return batch
    for t in (128, 64, 32, 16, 8):
        if batch % t == 0 and batch // t >= 2:
            return t
    return batch


def _conv_stack(xcol, w1b, w2b, b_pad, tb):
    m_blk = tb * _PQ_PAD
    steps = b_pad // tb
    return pl.pallas_call(
        _conv_stack_kernel,
        out_shape=jax.ShapeDtypeStruct((b_pad * _PQ_PAD, _C2_PAD), jnp.bfloat16),
        grid=(steps,),
        in_specs=[
            pl.BlockSpec((m_blk, _K1_PAD), lambda i: (i, 0)),
            pl.BlockSpec((_K1_PAD, _N1), lambda i: (0, 0)),   # weights resident
            pl.BlockSpec((_N1, _C2_PAD), lambda i: (0, 0)),
        ],
        out_specs=pl.BlockSpec((m_blk, _C2_PAD), lambda i: (i, 0)),
        scratch_shapes=[pltpu.VMEM((m_blk, _N1), jnp.bfloat16)],
        compiler_params=pltpu.CompilerParams(
            dimension_semantics=("parallel",),
            vmem_limit_bytes=_VMEM_LIMIT),
    )(xcol, w1b, w2b)


def _linear(x, w, b):
    batch, k = x.shape
    n = w.shape[1]
    tb = _linear_batch_tile(batch)
    steps = batch // tb
    return pl.pallas_call(
        _linear_kernel,
        out_shape=jax.ShapeDtypeStruct((batch, n), jnp.float32),
        grid=(steps,),
        in_specs=[
            pl.BlockSpec((tb, k), lambda i: (i, 0)),
            pl.BlockSpec((k, n), lambda i: (0, 0)),           # weight resident
            pl.BlockSpec((1, n), lambda i: (0, 0)),
        ],
        out_specs=pl.BlockSpec((tb, n), lambda i: (i, 0)),
        compiler_params=pltpu.CompilerParams(
            dimension_semantics=("parallel",),
            vmem_limit_bytes=_VMEM_LIMIT),
    )(x, w, b)


# ------------------------- trace-time glue ----------------------------------

def _build_patch_columns(x, b_pad):
    """x: (B, 28, 28) -> (b_pad*56, 128) bf16 patch-column table.

    Column (t2*9 + t1), row (b*56 + p*7 + q) holds
        X[b, 4p + 2*ki2 + ki1 - 3, 4q + 2*kj2 + kj1 - 3]   (0 outside image),
    i.e. exactly the input pixel that conv1-tap t1 of conv2-tap t2 needs for
    conv2 output position (p, q).  Both convs' zero padding falls out
    automatically because neither conv has a bias (ReLU(0) == 0).  Columns
    81..127 and rows 49..55 of each image are zero padding.
    """
    b = x.shape[0]
    if b_pad > b:
        x = jnp.pad(x, ((0, b_pad - b), (0, 0), (0, 0)))
    xpad = jnp.pad(x, ((0, 0), (3, 3), (3, 3))).astype(jnp.bfloat16)
    cols = []
    for ki2 in range(3):
        for kj2 in range(3):
            for ki1 in range(3):
                for kj1 in range(3):
                    r0 = 2 * ki2 + ki1
                    c0 = 2 * kj2 + kj1
                    sl = xpad[:, r0:r0 + 25:4, c0:c0 + 25:4]       # (B, 7, 7)
                    cols.append(sl.reshape(b_pad, _PQ))
    xcol = jnp.stack(cols, axis=-1)                                # (B, 49, 81)
    xcol = jnp.pad(xcol, ((0, 0), (0, _PQ_PAD - _PQ), (0, _K1_PAD - _K1)))
    return xcol.reshape(b_pad * _PQ_PAD, _K1_PAD)


def _conv1_block_weight(w1):
    # torch conv1 weight (32, 1, 3, 3) -> block-diagonal (128, 288):
    # row = t2*9 + t1 (zero rows 81..127), col = t2*32 + out_channel.
    w1m = w1.reshape(32, 9).T                                      # (9, 32)
    w1b = jnp.kron(jnp.eye(9, dtype=w1.dtype), w1m)                # (81, 288)
    w1b = jnp.pad(w1b, ((0, _K1_PAD - _K1), (0, 0)))
    return w1b.astype(jnp.bfloat16)


def _conv2_weight(w2):
    # torch conv2 weight (64, 32, 3, 3) -> (288, 128): row = t2*32 + in_ch,
    # output channels zero-padded 64 -> 128 for lane-dense stores.
    w2b = jnp.transpose(w2, (2, 3, 1, 0)).reshape(_N1, _C2)
    w2b = jnp.pad(w2b, ((0, 0), (0, _C2_PAD - _C2)))
    return w2b.astype(jnp.bfloat16)


def _linear_weights(w_lin, b_lin):
    # torch linear expects the NCHW flatten (d*49 + pq); the conv kernel emits
    # features ordered (pq*128 + d) with pq padded to 56 and d padded to 128.
    # Fold the permutation AND both zero paddings into the weight so the
    # kernel input is a free contiguous view of the conv output.
    n_out = w_lin.shape[0]
    n_pad = max(128, ((n_out + 127) // 128) * 128)
    wk = jnp.transpose(w_lin.reshape(n_out, _C2, _PQ), (2, 1, 0))   # (49,64,n)
    wk = jnp.pad(wk, ((0, _PQ_PAD - _PQ), (0, _C2_PAD - _C2),
                      (0, n_pad - n_out)))
    wk = wk.reshape(_KLIN, n_pad).astype(jnp.bfloat16)              # (7168, n)
    bk = jnp.pad(b_lin, (0, n_pad - n_out)).astype(jnp.float32).reshape(1, n_pad)
    return wk, bk


def encoder_forward(x_nchw, params):
    """Pallas implementation of Encoder.forward.  x_nchw: (B, 1, 28, 28)."""
    b = x_nchw.shape[0]
    n_out = params["w_lin"].shape[0]

    tbc = _conv_batch_tile(b)
    steps = pl.cdiv(b, tbc)
    b_pad = steps * tbc                      # padded images are exact zeros

    xcol = _build_patch_columns(x_nchw[:, 0], b_pad)     # (b_pad*56, 128) bf16
    w1b = _conv1_block_weight(params["w1"])              # (128, 288) bf16
    w2b = _conv2_weight(params["w2"])                    # (288, 128) bf16
    wk, bk = _linear_weights(params["w_lin"], params["b_lin"])

    h2 = _conv_stack(xcol, w1b, w2b, b_pad, tbc)         # (b_pad*56, 128) bf16
    feats = h2.reshape(b_pad, _KLIN)                     # free contiguous view
    out = _linear(feats, wk, bk)                         # (b_pad, n_pad) f32
    return out[:b, :n_out]


# ------------------------------- reference ----------------------------------

def encoder_reference(x_nchw, params):
    """Pure-JAX f32 reference (matches the PyTorch forward)."""
    dn = ("NCHW", "OIHW", "NCHW")
    y = lax.conv_general_dilated(x_nchw, params["w1"], (2, 2),
                                 [(1, 1), (1, 1)], dimension_numbers=dn)
    y = jnp.maximum(y, 0.0)
    y = lax.conv_general_dilated(y, params["w2"], (2, 2),
                                 [(1, 1), (1, 1)], dimension_numbers=dn)
    y = jnp.maximum(y, 0.0)
    flat = y.reshape(y.shape[0], -1)                     # NCHW flatten
    return flat @ params["w_lin"].T + params["b_lin"]


# --------------------------------- main --------------------------------------

if __name__ == "__main__":
    latent_dim = 16
    B = 2  # spatial must be 28x28 (the Linear expects 7*7*64 features)

    key = jax.random.PRNGKey(0)
    k1, k2, k3, k4, k5 = jax.random.split(key, 5)
    params = {
        "w1": jax.random.normal(k1, (32, 1, 3, 3), jnp.float32) * 0.1,
        "w2": jax.random.normal(k2, (64, 32, 3, 3), jnp.float32) * 0.05,
        "w_lin": jax.random.normal(k3, (2 * latent_dim, 7 * 7 * 64),
                                   jnp.float32) * 0.02,
        "b_lin": jax.random.normal(k4, (2 * latent_dim,), jnp.float32) * 0.01,
    }
    x = jax.random.normal(k5, (B, 1, 28, 28), jnp.float32)

    out = jax.block_until_ready(jax.jit(encoder_forward)(x, params))
    ref = jax.block_until_ready(jax.jit(encoder_reference)(x, params))

    assert out.shape == (B, 2 * latent_dim), out.shape
    max_err = float(jnp.max(jnp.abs(out - ref)))
    assert jnp.allclose(out, ref, rtol=2e-2, atol=2e-2), max_err

    print("KERNEL_OK")
</pallas_src>

<mosaic_0001>
module attributes {stable_mosaic.version = 11 : i64} {
  func.func @_conv_stack_kernel(%arg0: i32, %arg1: memref<56x128xbf16, #tpu.memory_space<vmem>>, %arg2: memref<128x288xbf16, #tpu.memory_space<vmem>>, %arg3: memref<288x128xbf16, #tpu.memory_space<vmem>>, %arg4: memref<56x128xbf16, #tpu.memory_space<vmem>>, %arg5: memref<56x288xbf16, #tpu.memory_space<vmem>>) attributes {dimension_semantics = [#tpu.dimension_semantics<parallel>], iteration_bounds = array<i64: 2>, scalar_prefetch = 0 : i64, scratch_operands = 1 : i64, tpu.core_type = #tpu.core_type<tc>, window_params = [{transform_indices = @transform_0, window_bounds = array<i64: 56, 128>}, {pipeline_mode = #tpu.pipeline_mode<synchronous>, transform_indices = @transform_1, window_bounds = array<i64: 128, 288>}, {pipeline_mode = #tpu.pipeline_mode<synchronous>, transform_indices = @transform_2, window_bounds = array<i64: 288, 128>}, {transform_indices = @transform_3, window_bounds = array<i64: 56, 128>}]} {
    %c0 = arith.constant 0 : index
    %c0_0 = arith.constant 0 : index
    %0 = vector.load %arg1[%c0, %c0_0] : memref<56x128xbf16, #tpu.memory_space<vmem>>, vector<56x128xbf16>
    %c0_1 = arith.constant 0 : index
    %c0_2 = arith.constant 0 : index
    %1 = vector.load %arg2[%c0_1, %c0_2] : memref<128x288xbf16, #tpu.memory_space<vmem>>, vector<128x288xbf16>
    %cst = arith.constant dense<0.000000e+00> : vector<56x288xf32>
    %2 = tpu.matmul %0, %1, %cst {dimension_numbers = #tpu.dot_dimension_numbers<[1], [0], [0], [1], [0, 0, 1, 1], [], []>} : vector<56x128xbf16>, vector<128x288xbf16>, vector<56x288xf32> -> vector<56x288xf32>
    %cst_3 = arith.constant 0.000000e+00 : f32
    %3 = vector.broadcast %cst_3 : f32 to vector<56x288xf32>
    %4 = arith.maximumf %2, %3 : vector<56x288xf32>
    %5 = arith.truncf %4 : vector<56x288xf32> to vector<56x288xbf16>
    %c0_4 = arith.constant 0 : index
    %c0_5 = arith.constant 0 : index
    %6 = vector.load %arg5[%c0_4, %c0_5] : memref<56x288xbf16, #tpu.memory_space<vmem>>, vector<56x288xbf16>
    tpu.vector_store %arg5[%c0_4, %c0_5], %5 {strides = array<i32>} : memref<56x288xbf16, #tpu.memory_space<vmem>>, vector<56x288xbf16>,
    %c0_6 = arith.constant 0 : index
    %c0_7 = arith.constant 0 : index
    %7 = vector.load %arg5[%c0_6, %c0_7] : memref<56x288xbf16, #tpu.memory_space<vmem>>, vector<56x288xbf16>
    %c0_8 = arith.constant 0 : index
    %c0_9 = arith.constant 0 : index
    %8 = vector.load %arg3[%c0_8, %c0_9] : memref<288x128xbf16, #tpu.memory_space<vmem>>, vector<288x128xbf16>
    %cst_10 = arith.constant dense<0.000000e+00> : vector<56x128xf32>
    %9 = tpu.matmul %7, %8, %cst_10 {dimension_numbers = #tpu.dot_dimension_numbers<[1], [0], [0], [1], [0, 0, 1, 1], [], []>} : vector<56x288xbf16>, vector<288x128xbf16>, vector<56x128xf32> -> vector<56x128xf32>
    %cst_11 = arith.constant 0.000000e+00 : f32
    %10 = vector.broadcast %cst_11 : f32 to vector<56x128xf32>
    %11 = arith.maximumf %9, %10 : vector<56x128xf32>
    %12 = arith.truncf %11 : vector<56x128xf32> to vector<56x128xbf16>
    %c0_12 = arith.constant 0 : index
    %c0_13 = arith.constant 0 : index
    %13 = vector.load %arg4[%c0_12, %c0_13] : memref<56x128xbf16, #tpu.memory_space<vmem>>, vector<56x128xbf16>
    tpu.vector_store %arg4[%c0_12, %c0_13], %12 {strides = array<i32>} : memref<56x128xbf16, #tpu.memory_space<vmem>>, vector<56x128xbf16>,
    return
  }
  func.func @transform_0(%arg0: i32) -> (i32, i32) {
    %c0_i32 = arith.constant 0 : i32
    %c0_i32_0 = arith.constant 0 : i32
    return %arg0, %c0_i32 : i32, i32
  }
  func.func @transform_1(%arg0: i32) -> (i32, i32) {
    %c0_i32 = arith.constant 0 : i32
    %c0_i32_0 = arith.constant 0 : i32
    %c0_i32_1 = arith.constant 0 : i32
    return %c0_i32, %c0_i32_0 : i32, i32
  }
  func.func @transform_2(%arg0: i32) -> (i32, i32) {
    %c0_i32 = arith.constant 0 : i32
    %c0_i32_0 = arith.constant 0 : i32
    %c0_i32_1 = arith.constant 0 : i32
    return %c0_i32, %c0_i32_0 : i32, i32
  }
  func.func @transform_3(%arg0: i32) -> (i32, i32) {
    %c0_i32 = arith.constant 0 : i32
    %c0_i32_0 = arith.constant 0 : i32
    return %arg0, %c0_i32 : i32, i32
  }
}

module attributes {stable_mosaic.version = 11 : i64} {
  func.func @_linear_kernel(%arg0: i32, %arg1: memref<2x7168xbf16, #tpu.memory_space<vmem>>, %arg2: memref<7168x128xbf16, #tpu.memory_space<vmem>>, %arg3: memref<1x128xf32, #tpu.memory_space<vmem>>, %arg4: memref<2x128xf32, #tpu.memory_space<vmem>>) attributes {dimension_semantics = [#tpu.dimension_semantics<parallel>], iteration_bounds = array<i64: 1>, scalar_prefetch = 0 : i64, scratch_operands = 0 : i64, tpu.core_type = #tpu.core_type<tc>, window_params = [{transform_indices = @transform_0, window_bounds = array<i64: 2, 7168>}, {pipeline_mode = #tpu.pipeline_mode<synchronous>, transform_indices = @transform_1, window_bounds = array<i64: 7168, 128>}, {pipeline_mode = #tpu.pipeline_mode<synchronous>, transform_indices = @transform_2, window_bounds = array<i64: 1, 128>}, {transform_indices = @transform_3, window_bounds = array<i64: 2, 128>}]} {
    %c0 = arith.constant 0 : index
    %c0_0 = arith.constant 0 : index
    %0 = vector.load %arg1[%c0, %c0_0] : memref<2x7168xbf16, #tpu.memory_space<vmem>>, vector<2x7168xbf16>
    %c0_1 = arith.constant 0 : index
    %c0_2 = arith.constant 0 : index
    %1 = vector.load %arg2[%c0_1, %c0_2] : memref<7168x128xbf16, #tpu.memory_space<vmem>>, vector<7168x128xbf16>
    %cst = arith.constant dense<0.000000e+00> : vector<2x128xf32>
    %2 = tpu.matmul %0, %1, %cst {dimension_numbers = #tpu.dot_dimension_numbers<[1], [0], [0], [1], [0, 0, 1, 1], [], []>} : vector<2x7168xbf16>, vector<7168x128xbf16>, vector<2x128xf32> -> vector<2x128xf32>
    %c0_3 = arith.constant 0 : index
    %c0_4 = arith.constant 0 : index
    %3 = vector.load %arg3[%c0_3, %c0_4] : memref<1x128xf32, #tpu.memory_space<vmem>>, vector<1x128xf32>
    %4 = vector.broadcast %3 : vector<1x128xf32> to vector<2x128xf32>
    %5 = arith.addf %2, %4 : vector<2x128xf32>
    %c0_5 = arith.constant 0 : index
    %c0_6 = arith.constant 0 : index
    %6 = vector.load %arg4[%c0_5, %c0_6] : memref<2x128xf32, #tpu.memory_space<vmem>>, vector<2x128xf32>
    tpu.vector_store %arg4[%c0_5, %c0_6], %5 {strides = array<i32>} : memref<2x128xf32, #tpu.memory_space<vmem>>, vector<2x128xf32>,
    return
  }
  func.func @transform_0(%arg0: i32) -> (i32, i32) {
    %c0_i32 = arith.constant 0 : i32
    %c0_i32_0 = arith.constant 0 : i32
    return %arg0, %c0_i32 : i32, i32
  }
  func.func @transform_1(%arg0: i32) -> (i32, i32) {
    %c0_i32 = arith.constant 0 : i32
    %c0_i32_0 = arith.constant 0 : i32
    %c0_i32_1 = arith.constant 0 : i32
    return %c0_i32, %c0_i32_0 : i32, i32
  }
  func.func @transform_2(%arg0: i32) -> (i32, i32) {
    %c0_i32 = arith.constant 0 : i32
    %c0_i32_0 = arith.constant 0 : i32
    %c0_i32_1 = arith.constant 0 : i32
    return %c0_i32, %c0_i32_0 : i32, i32
  }
  func.func @transform_3(%arg0: i32) -> (i32, i32) {
    %c0_i32 = arith.constant 0 : i32
    %c0_i32_0 = arith.constant 0 : i32
    return %arg0, %c0_i32 : i32, i32
  }
}

</mosaic_0001>

<bundles_post_ra>
// kernel: encoder_forward.2
= control target key start
LH: loop header
LB: loop body
LE: loop exit
PB: predicated region body
PF: predicated region fallthrough
CT: control target
= control target key end

     0   :  { %s1405_s12 = smov 0   ;;  %s1576_s0 = inlined_call_operand.vmem [shape: bf16[112,128], index: 0, kind: input, shape index: {}]   ;;  %s1577_s1 = inlined_call_operand.vmem [shape: bf16[128,288], index: 1, kind: input, shape index: {}]   ;;  %s1578_s2 = inlined_call_operand.vmem [shape: bf16[288,128], index: 2, kind: input, shape index: {}]   ;;  %s1579_s3 = inlined_call_operand.vmem [shape: bf16[112,128], index: 3, kind: output, shape index: {}]  }
   0x1 LB: > { %s1061_s13 = sadd.s32 4294967295, %s1382_s12   ;;  %p1065_p0 = scmp.ge.s32.totalorder %s1382_s12, 1  ;;  %s1382_s12 = sphi %s1405_s12, %s13_s12  }
   0x2   : > { %p138_p1 = scmp.lt.s32.totalorder %s1382_s12, 3 }
   0x4   : > { %p139_p2 = pnand %p1065_p0, %p138_p1 }
   0x5   : > { %s162_s16 = smul.u32 (!%p139_p2), 7, %s1061_s13 }
   0x6   : > { %142 = sbr.rel (%p139_p2) target bundleno = 490 (0x1ea), region = 32 }
   0x7   : > { %p163_p3 = scmp.lt.s32.totalorder (!%p139_p2), %s162_s16, 13 }
   0xb   : > { %v1310_v0 = vld [vmem:[%s1577_s1 + $0xac] ss:$12 sps:$4 sm:$0xff]   ;;  %v1312_v1 = vld [vmem:[%s1577_s1 + $0xa8] ss:$12 sps:$4 sm:$0xff]   ;;  %v1384_v2 = vmov 0   ;;  %s1581_s16 = smov (!%p163_p3, %s162_s16), 13 }
   0xc   : > { %396 = vmatprep.mubr.bf16.mxu0 %v1384_v2  ;;  %364 = vmatprep.subr.bf16.mxu0 %v1310_v0  ;;  %v1313_v3 = vld [vmem:[%s1577_s1 + $0x94] ss:$12 sps:$4 sm:$0xff]   ;;  %v1315_v4 = vld [vmem:[%s1577_s1 + $0x90] ss:$12 sps:$4 sm:$0xff]   ;;  %v1318_v6 = vld [vmem:[%s1577_s1 + $0x78] ss:$12 sps:$4 sm:$0xff]  }
   0xd   : > { %365 = vmatpush1.bf16.msra.mxu0 %v1312_v1  ;;  %v1316_v5 = vld [vmem:[%s1577_s1 + $0x7c] ss:$12 sps:$4 sm:$0xff]   ;;  %v1319_v7 = vld [vmem:[%s1577_s1 + $0x64] ss:$12 sps:$4 sm:$0xff]   ;;  %s1066_s4 = sshll.u32 %s1581_s16, 2  ;;  %vm594_vm0 = vcmask 257024  }
   0xe   : > { %366 = vmatprep.subr.bf16.mxu0 %v1313_v3  ;;  %v1328_v8 = vld [vmem:[%s1577_s1 + $0xb0] ss:$12 sps:$4 sm:$0xff]   ;;  %v1321_v9 = vld [vmem:[%s1577_s1 + $0x60] ss:$12 sps:$4 sm:$0xff]   ;;  %v1332_v10 = vld [vmem:[%s1577_s1 + $0x98] ss:$12 sps:$4 sm:$0xff]   ;;  %s1455_s14 = scalar_lea.vmem %s1576_s0, %s1066_s4  ;;  %s172_s7 = scalar_lea.vmem %s1579_s3, %s1066_s4 }
   0xf   : > { %1249 = vmatprep.subr.bf16.mxu1 %v1328_v8  ;;  %v1322_v11 = vld [vmem:[%s1577_s1 + $0x4c] ss:$12 sps:$4 sm:$0xff]   ;;  %v1324_v12 = vld [vmem:[%s1577_s1 + $0x48] ss:$12 sps:$4 sm:$0xff]   ;;  %v1337_v15 = vld [vmem:[%s1455_s14] sm:$0xff]   ;;  %vm821_vm1 = vcmask 261120  }
  0x10   : > { %1250 = vmatpush3.bf16.msra.mxu1 %v1328_v8  ;;  %v1336_v13 = vld [vmem:[%s1577_s1 + $0x80] ss:$12 sps:$4 sm:$0xff]   ;;  %v1338_v16 = vld [vmem:[%s1577_s1 + $0x68] ss:$12 sps:$4 sm:$0xff]   ;;  %1265 = vmatprep.mubr.bf16.mxu1 %v1337_v15  ;;  %v1327_v17 = vld [vmem:[%s1577_s1 + $0x30] ss:$12 sps:$4 sm:$0xff]  }
  0x11   : > { %367 = vmatpush1.bf16.msra.mxu0 %v1315_v4  ;;  %1251 = vmatprep.subr.bf16.mxu1 %v1332_v10  ;;  %v1325_v14 = vld [vmem:[%s1577_s1 + $0x34] ss:$12 sps:$4 sm:$0xff]   ;;  %v1329_v18 = vld [vmem:[%s1577_s1 + $0x1c] ss:$12 sps:$4 sm:$0xff]   ;;  %v1331_v20 = vld [vmem:[%s1577_s1 + $0x18] ss:$12 sps:$4 sm:$0xff]  }
  0x12   : > { %368 = vmatprep.subr.bf16.mxu0 %v1316_v5  ;;  %v1339_v19 = vld [vmem:[%s1577_s1 + $0x50] ss:$12 sps:$4 sm:$0xff]   ;;  %v1341_v22 = vld [vmem:[%s1577_s1 + $0x38] ss:$12 sps:$4 sm:$0xff]   ;;  %v1335_v23 = vld [vmem:[%s1577_s1] ss:$12 sps:$4 sm:$0xff]  }
  0x13   : > { %v1333_v21 = vld [vmem:[%s1577_s1 + $0x4] ss:$12 sps:$4 sm:$0xff]   ;;  %v1342_v24 = vld [vmem:[%s1577_s1 + $0x20] ss:$12 sps:$4 sm:$0xff]   ;;  %v1346_v25 = vld [vmem:[%s1578_s2 + $0x78] sm:$0xff]  }
  0x14   : > { %1252 = vmatpush3.bf16.msra.mxu1 %v1332_v10  ;;  %v1344_v26 = vld [vmem:[%s1577_s1 + $0x8] ss:$12 sps:$4 sm:$0xff]   ;;  %v1347_v27 = vld [vmem:[%s1578_s2 + $0x38] sm:$0xff]   ;;  %v1352_v35 = vld [vmem:[%s1578_s2 + $0x60] sm:$0xff]  }
  0x15   : > { %369 = vmatpush1.bf16.msra.mxu0 %v1318_v6  ;;  %1253 = vmatprep.subr.bf16.mxu1 %v1336_v13  ;;  %v1348_v28 = vld [vmem:[%s1578_s2 + $0x70] sm:$0xff]   ;;  %v1350_v30 = vld [vmem:[%s1578_s2 + $0x68] sm:$0xff]   ;;  %v1345_v34 = vld [vmem:[%s1455_s14 + $0x18] ss:$0 sps:$4 sm:$0xff]  }
  0x16   : > { %370 = vmatprep.subr.bf16.mxu0 %v1319_v7  ;;  %v1349_v29 = vld [vmem:[%s1578_s2 + $0x30] sm:$0xff]   ;;  %v1340_v31 = vld [vmem:[%s1455_s14 + $0x8] sm:$0xff]   ;;  %v1353_v36 = vld [vmem:[%s1578_s2 + $0x20] sm:$0xff]  }
  0x17   : > { %v1351_v32 = vld [vmem:[%s1578_s2 + $0x28] sm:$0xff]   ;;  %v1343_v33 = vld [vmem:[%s1455_s14 + $0x10] sm:$0xff]   ;;  %v1354_v37 = vld [vmem:[%s1578_s2 + $0x58] sm:$0xff]  }
  0x18   : > { %1254 = vmatpush3.bf16.msra.mxu1 %v1336_v13  ;;  %v1355_v38 = vld [vmem:[%s1578_s2 + $0x18] sm:$0xff]   ;;  %v1356_v39 = vld [vmem:[%s1578_s2 + $0x50] sm:$0xff]   ;;  %v1358_v41 = vld [vmem:[%s1578_s2 + $0x48] sm:$0xff]  }
  0x19   : > { %371 = vmatpush1.bf16.msra.mxu0 %v1321_v9  ;;  %1255 = vmatprep.subr.bf16.mxu1 %v1338_v16  ;;  %v1357_v40 = vld [vmem:[%s1578_s2 + $0x10] sm:$0xff]   ;;  %v1359_v42 = vld [vmem:[%s1578_s2 + $0x8] sm:$0xff]   ;;  %v1360_v43 = vld [vmem:[%s1578_s2 + $0x40] sm:$0xff]  }
  0x1a   : > { %372 = vmatprep.subr.bf16.mxu0 %v1322_v11  ;;  %v1361_v44 = vld [vmem:[%s1578_s2] sm:$0xff]   ;;  %v1554_v45 = vld [vmem:[%s1578_s2 + $0x88] sm:$0xff]  }
  0x1c   : > { %1256 = vmatpush3.bf16.msra.mxu1 %v1338_v16 }
  0x1d   : > { %373 = vmatpush1.bf16.msra.mxu0 %v1324_v12  ;;  %1257 = vmatprep.subr.bf16.mxu1 %v1339_v19 }
  0x1e   : > { %374 = vmatprep.subr.bf16.mxu0 %v1325_v14 }
  0x20   : > { %1258 = vmatpush3.bf16.msra.mxu1 %v1339_v19 }
  0x21   : > { %375 = vmatpush1.bf16.msra.mxu0 %v1327_v17  ;;  %1259 = vmatprep.subr.bf16.mxu1 %v1341_v22 }
  0x22   : > { %376 = vmatprep.subr.bf16.mxu0 %v1329_v18 }
  0x24   : > { %1260 = vmatpush3.bf16.msra.mxu1 %v1341_v22 }
  0x25   : > { %377 = vmatpush1.bf16.msra.mxu0 %v1331_v20  ;;  %1261 = vmatprep.subr.bf16.mxu1 %v1342_v24 }
  0x26   : > { %378 = vmatprep.subr.bf16.mxu0 %v1333_v21 }
  0x28   : > { %1262 = vmatpush3.bf16.msra.mxu1 %v1342_v24 }
  0x29   : > { %379 = vmatpush1.bf16.msra.mxu0 %v1335_v23  ;;  %1263 = vmatprep.subr.bf16.mxu1 %v1344_v26 }
  0x2a   : > { %1203 = vmatprep.subr.bf16.mxu0 %v1346_v25 }
  0x2c   : > { %397 = vmatmul.mubr.bf16.vlgmr.msra.gmra.mxu0 %v1337_v15  ;;  %1264 = vmatpush3.bf16.msra.mxu1 %v1344_v26 }
  0x2d   : > { %406 = vmatprep.mubr.bf16.mxu0 %v1384_v2  ;;  %1204 = vmatpush3.bf16.msra.mxu0 %v1347_v27 }
  0x2e   : > { %1205 = vmatprep.subr.bf16.mxu0 %v1348_v28  ;;  %1285 = vmatprep.subr.bf16.mxu1 %v1346_v25 }
  0x2f   : > { %1266 = vmatmul.mubr.bf16.vlgmr.msra.gmra.mxu1 %v1340_v31 }
  0x30   : > { %1269 = vmatprep.mubr.bf16.mxu1 %v1343_v33  ;;  %1293 = vmatpush3.bf16.msra.mxu1 %v1347_v27 }
  0x31   : > { %1206 = vmatpush3.bf16.msra.mxu0 %v1349_v29  ;;  %1286 = vmatprep.subr.bf16.mxu1 %v1348_v28 }
  0x32   : > { %1207 = vmatprep.subr.bf16.mxu0 %v1350_v30 }
  0x34   : > { %407 = vmatmul.mubr.bf16.gmra.mxu0 %v1340_v31  ;;  %1294 = vmatpush3.bf16.msra.mxu1 %v1349_v29 }
  0x35   : > { %416 = vmatprep.mubr.bf16.mxu0 %v1384_v2  ;;  %1208 = vmatpush3.bf16.msra.mxu0 %v1351_v32 }
  0x36   : > { %1287 = vmatprep.subr.bf16.mxu1 %v1350_v30  ;;  %1209 = vmatprep.subr.bf16.mxu0 %v1352_v35 }
  0x37   : > { %1270 = vmatmul.mubr.bf16.gmra.mxu1 %v1345_v34 }
  0x38   : > { %1295 = vmatpush3.bf16.msra.mxu1 %v1351_v32 }
  0x39   : > { %1288 = vmatprep.subr.bf16.mxu1 %v1352_v35  ;;  %1210 = vmatpush3.bf16.msra.mxu0 %v1353_v36 }
  0x3a   : > { %1211 = vmatprep.subr.bf16.mxu0 %v1354_v37 }
  0x3c   : > { %417 = vmatmul.mubr.bf16.gmra.mxu0 %v1343_v33  ;;  %1296 = vmatpush3.bf16.msra.mxu1 %v1353_v36 }
  0x3d   : > { %426 = vmatprep.mubr.bf16.mxu0 %v1384_v2  ;;  %1289 = vmatprep.subr.bf16.mxu1 %v1354_v37 }
  0x3e   : > { %1212 = vmatpush3.bf16.msra.mxu0 %v1355_v38 }
  0x3f   : > { %1213 = vmatprep.subr.bf16.mxu0 %v1356_v39 }
  0x40   : > { %1297 = vmatpush3.bf16.msra.mxu1 %v1355_v38 }
  0x41   : > { %1290 = vmatprep.subr.bf16.mxu1 %v1356_v39 }
  0x42   : > { %1214 = vmatpush3.bf16.msra.mxu0 %v1357_v40 }
  0x43   : > { %1215 = vmatprep.subr.bf16.mxu0 %v1358_v41 }
  0x44   : > { %427 = vmatmul.mubr.bf16.gmra.mxu0 %v1345_v34  ;;  %1298 = vmatpush3.bf16.msra.mxu1 %v1357_v40 }
  0x45   : > { %1291 = vmatprep.subr.bf16.mxu1 %v1358_v41 }
  0x46   : > { %1216 = vmatpush3.bf16.msra.mxu0 %v1359_v42 }
  0x47   : > { %1217 = vmatprep.subr.bf16.mxu0 %v1360_v43 }
  0x48   : > { %1299 = vmatpush3.bf16.msra.mxu1 %v1359_v42 }
  0x49   : > { %1292 = vmatprep.subr.bf16.mxu1 %v1360_v43  ;;  %v1364_v43 = vld [vmem:[%s1578_s2 + $0x80] sm:$0xff]  }
  0x4a   : > { %1218 = vmatpush3.bf16.msra.mxu0 %v1361_v44 }
  0x4c   : > { %1300 = vmatpush3.bf16.msra.mxu1 %v1361_v44 }
  0x4d   : > { %1273 = vmatprep.subr.bf16.mxu1 %v1554_v45 }
  0xec   : > { %v398_v46 = vpop.f32.mrf.mxu0 }
  0xed   : > { %v499_v48 = vmax.f32 %v398_v46, 0.0 }
  0xee   : > { %v400_v47 = vpop.f32.mrf.mxu0 }
  0xef   : > { %v500_v49 = vmax.f32 %v400_v47, 0.0  ;;  %v1267_v55 = vpop.f32.mrf.mxu1 }
  0xf0   : > { %v402_v50 = vpop.f32.mrf.mxu0  ;;  %v507_v56 = vmax.f32 %v1267_v55, 0.0 }
  0xf1   : > { %v502_v52 = vmax.f32 %v402_v50, 0.0  ;;  %v469_v59 = vpop.f32.mrf.mxu1 }
  0xf2   : > { %v404_v51 = vpop.f32.mrf.mxu0  ;;  %v1158_v63 = vpack.c.bf16 %v507_v56, %v507_v56  ;;  %v501_v1 = vmax.f32 %v469_v59, 0.0 }
  0xf3   : > { %v503_v53 = vmax.f32 %v404_v51, 0.0  ;;  %v1368_v61 = vpack.c.bf16 %v502_v52, %v499_v48  ;;  %v1268_v2 = vpop.f32.mrf.mxu1 }
  0xf4   : > { %v408_v54 = vpop.f32.mrf.mxu0  ;;  %599 = vst.msk [vmem:[#allocation2 + $0x20] sm:$0xf] %vm594_vm0, %v1158_v63  ;;  %v510_v3 = vmax.f32 %v1268_v2, 0.0  ;;  %v1154_v5 = vpack.c.bf16 %v501_v1, %v501_v1 }
  0xf5   : > { %v505_v57 = vmax.f32 %v408_v54, 0.0  ;;  %v1369_v62 = vpack.c.bf16 %v503_v53, %v500_v49  ;;  %v472_v6 = vpop.f32.mrf.mxu1 }
  0xf6   : > { %v410_v58 = vpop.f32.mrf.mxu0  ;;  %v1160_v9 = vpack.c.bf16 %v510_v3, %v510_v3  ;;  %v504_v10 = vmax.f32 %v472_v6, 0.0  ;;  %595 = vst.msk [vmem:[#allocation2 + $0x8] sm:$0xf] %vm594_vm0, %v1154_v5 }
  0xf7   : > { %v506_v60 = vmax.f32 %v410_v58, 0.0  ;;  %866 = vmatprep.mubr.bf16.mxu0 %v1369_v62  ;;  %v1271_v12 = vpop.f32.mrf.mxu1 }
  0xf8   : > { %v412_v0 = vpop.f32.mrf.mxu0  ;;  %867 = vmatmul.mubr.bf16.vlgmr.msra.gmra.mxu0 %v1368_v61  ;;  %601 = vst.msk [vmem:[#allocation2 + $0x2c] sm:$0xf] %vm594_vm0, %v1160_v9  ;;  %v1156_v13 = vpack.c.bf16 %v504_v10, %v504_v10  ;;  %v519_v14 = vmax.f32 %v1271_v12, 0.0 }
  0xf9   : > { %v508_v7 = vmax.f32 %v412_v0, 0.0  ;;  %v485_v17 = vpop.f32.mrf.mxu1 }
  0xfa   : > { %v414_v4 = vpop.f32.mrf.mxu0  ;;  %597 = vst.msk [vmem:[#allocation2 + $0x14] sm:$0xf] %vm594_vm0, %v1156_v13  ;;  %v1166_v20 = vpack.c.bf16 %v519_v14, %v519_v14  ;;  %v513_v23 = vmax.f32 %v485_v17, 0.0 }
  0xfb   : > { %v509_v8 = vmax.f32 %v414_v4, 0.0  ;;  %v1371_v21 = vpack.c.bf16 %v508_v7, %v505_v57  ;;  %v1272_v24 = vpop.f32.mrf.mxu1 }
  0xfc   : > { %v418_v11 = vpop.f32.mrf.mxu0  ;;  %607 = vst.msk [vmem:[#allocation2 + $0x50] sm:$0xf] %vm594_vm0, %v1166_v20  ;;  %v1162_v26 = vpack.c.bf16 %v513_v23, %v513_v23 }
  0xfd   : > { %v511_v15 = vmax.f32 %v418_v11, 0.0  ;;  %v1370_v19 = vpack.c.bf16 %v509_v8, %v506_v60  ;;  %v488_v27 = vpop.f32.mrf.mxu1 }
  0xfe   : > { %v420_v16 = vpop.f32.mrf.mxu0  ;;  %v516_v30 = vmax.f32 %v488_v27, 0.0  ;;  %603 = vst.msk [vmem:[#allocation2 + $0x38] sm:$0xf] %vm594_vm0, %v1162_v26 }
  0xff   : > { %v512_v18 = vmax.f32 %v420_v16, 0.0  ;;  %874 = vmatprep.mubr.bf16.mxu0 %v1370_v19  ;;  %v1365_v46 = vld [vmem:[#allocation2 + $0x20] ss:$12 sps:$4 sm:$0xff]  }
 0x100   : > { %v422_v22 = vpop.f32.mrf.mxu0  ;;  %875 = vmatmul.mubr.bf16.gmra.mxu0 %v1371_v21  ;;  %v1164_v32 = vpack.c.bf16 %v516_v30, %v516_v30 }
 0x101   : > { %v514_v28 = vmax.f32 %v422_v22, 0.0  ;;  %v1363_v42 = vld [vmem:[#allocation2 + $0x8] ss:$12 sps:$4 sm:$0xff]  }
 0x102   : > { %v424_v25 = vpop.f32.mrf.mxu0  ;;  %605 = vst.msk [vmem:[#allocation2 + $0x44] sm:$0xf] %vm594_vm0, %v1164_v32 }
 0x103   : > { %v515_v29 = vmax.f32 %v424_v25, 0.0  ;;  %v1373_v37 = vpack.c.bf16 %v514_v28, %v511_v15  ;;  %v1367_v47 = vld [vmem:[#allocation2 + $0x50] ss:$0 sps:$4 sm:$0xff]  }
 0x104   : > { %v428_v31 = vpop.f32.mrf.mxu0 }
 0x105   : > { %v517_v34 = vmax.f32 %v428_v31, 0.0  ;;  %v1372_v36 = vpack.c.bf16 %v515_v29, %v512_v18 }
 0x106   : > { %v430_v33 = vpop.f32.mrf.mxu0 }
 0x107   : > { %v518_v35 = vmax.f32 %v430_v33, 0.0  ;;  %882 = vmatprep.mubr.bf16.mxu0 %v1372_v36  ;;  %v1374_v40 = vpack.c.bf16 %v517_v34, %v517_v34 }
 0x108   : > { %v432_v38 = vpop.f32.mrf.mxu0  ;;  %883 = vmatmul.mubr.bf16.gmra.mxu0 %v1373_v37 }
 0x109   : > { %v1375_v41 = vpack.c.bf16 %v518_v35, %v518_v35  ;;  %v1366_v44 = vld [vmem:[#allocation2 + $0x38] ss:$12 sps:$4 sm:$0xff]  }
 0x10a   : > { %v433_v39 = vpop.f32.mrf.mxu0 }
 0x10b   : > { %890 = vmatprep.mubr.bf16.mxu1 %v1375_v41 }
 0x10c   : > { %891 = vmatmul.mubr.bf16.vlgmr.msra.gmra.mxu1 %v1374_v40 }
 0x10d   : > { %1274 = vmatpush3.bf16.msra.mxu1 %v1554_v45  ;;  %1277 = vmatprep.mubr.msk.bf16.mxu1 %vm821_vm1, %v1363_v42 }
 0x10e   : > { %1275 = vmatprep.subr.bf16.mxu1 %v1364_v43 }
 0x111   : > { %1276 = vmatpush3.bf16.msra.mxu1 %v1364_v43 }
 0x114   : > { %1278 = vmatmul.mubr.msk.bf16.vlgmr.msra.gmra.mxu1 %vm821_vm1, %v1365_v46 }
 0x115   : > { %1281 = vmatprep.mubr.msk.bf16.mxu1 %vm821_vm1, %v1366_v44 }
 0x11c   : > { %1282 = vmatmul.mubr.msk.bf16.gmra.mxu1 %vm821_vm1, %v1367_v47 }
 0x1b8   : > { %v1219_v48 = vpop.f32.mrf.mxu0 }
 0x1ba   : > { %v1220_v49 = vpop.f32.mrf.mxu0 }
 0x1bb   : > { %v1221_v0 = vadd.f32 %v1220_v49, %v1219_v48 }
 0x1bc   : > { %v1222_v50 = vpop.f32.mrf.mxu0 }
 0x1be   : > { %v1223_v51 = vpop.f32.mrf.mxu0 }
 0x1bf   : > { %v1224_v4 = vadd.f32 %v1223_v51, %v1222_v50 }
 0x1c0   : > { %v1225_v52 = vpop.f32.mrf.mxu0 }
 0x1c2   : > { %v1226_v53 = vpop.f32.mrf.mxu0 }
 0x1c3   : > { %v1227_v61 = vadd.f32 %v1226_v53, %v1225_v52 }
 0x1c4   : > { %v1228_v54 = vpop.f32.mrf.mxu0 }
 0x1c6   : > { %v1229_v56 = vpop.f32.mrf.mxu0 }
 0x1c7   : > { %v1230_v1 = vadd.f32 %v1229_v56, %v1228_v54 }
 0x1c8   : > { %v1231_v58 = vpop.f32.mrf.mxu0 }
 0x1ca   : > { %v1232_v62 = vpop.f32.mrf.mxu0 }
 0x1cb   : > { %v1233_v20 = vadd.f32 %v1232_v62, %v1231_v58 }
 0x1cc   : > { %v1237_v55 = vpop.f32.mrf.mxu1  ;;  %v1234_v7 = vpop.f32.mrf.mxu0 }
 0x1ce   : > { %v1238_v57 = vpop.f32.mrf.mxu1  ;;  %v1235_v18 = vpop.f32.mrf.mxu0 }
 0x1cf   : > { %v1239_v9 = vadd.f32 %v1238_v57, %v1237_v55  ;;  %v1236_v24 = vadd.f32 %v1235_v18, %v1234_v7 }
 0x1d0   : > { %v1240_v45 = vpop.f32.mrf.mxu1 }
 0x1d2   : > { %v1241_v59 = vpop.f32.mrf.mxu1 }
 0x1d4   : > { %v1279_v60 = vpop.f32.mrf.mxu1 }
 0x1d5   : > { %v941_v2 = vadd.f32 %v1279_v60, %v1227_v61 }
 0x1d6   : > { %v932_v63 = vpop.f32.mrf.mxu1 }
 0x1d7   : > { %v933_v5 = vadd.f32 %v1221_v0, %v932_v63  ;;  %v964_v10 = vmax.f32 %v941_v2, 0.0 }
 0x1d8   : > { %v1280_v3 = vpop.f32.mrf.mxu1 }
 0x1d9   : > { %v944_v6 = vadd.f32 %v1280_v3, %v1230_v1  ;;  %v962_v14 = vmax.f32 %v933_v5, 0.0 }
 0x1da   : > { %v935_v8 = vpop.f32.mrf.mxu1 }
 0x1db   : > { %v965_v11 = vmax.f32 %v944_v6, 0.0  ;;  %v936_v12 = vadd.f32 %v1224_v4, %v935_v8 }
 0x1dc   : > { %v1283_v13 = vpop.f32.mrf.mxu1 }
 0x1dd   : > { %v1182_v15 = vpack.c.bf16 %v965_v11, %v964_v10  ;;  %v963_v16 = vmax.f32 %v936_v12, 0.0  ;;  %v957_v17 = vadd.f32 %v1283_v13, %v1239_v9 }
 0x1de   : > { %v948_v19 = vpop.f32.mrf.mxu1 }
 0x1df   : > { %1189 = vst [vmem:[%s172_s7 + $0x8] sm:$0xff] %v1182_v15   ;;  %v1177_v21 = vpack.c.bf16 %v963_v16, %v962_v14  ;;  %v968_v22 = vmax.f32 %v957_v17, 0.0  ;;  %v949_v26 = vadd.f32 %v1233_v20, %v948_v19 }
 0x1e0   : > { %v1284_v23 = vpop.f32.mrf.mxu1 }
 0x1e1   : > { %1178 = vst [vmem:[%s172_s7] sm:$0xff] %v1177_v21   ;;  %v1173_v25 = vpack.c.bf16 %v968_v22, %v968_v22  ;;  %v966_v29 = vmax.f32 %v949_v26, 0.0 }
 0x1e2   : > { %v951_v27 = vpop.f32.mrf.mxu1 }
 0x1e3   : > { %1004 = vst [vmem:[%s172_s7 + $0x18] sm:$0xf] %v1173_v25  ;;  %v952_v28 = vadd.f32 %v1236_v24, %v951_v27 }
 0x1e5   : > { %v967_v30 = vmax.f32 %v952_v28, 0.0 }
 0x1e7   : > { %v1187_v31 = vpack.c.bf16 %v967_v30, %v966_v29 }
 0x1e9   : > { %1190 = vst [vmem:[%s172_s7 + $0x10] sm:$0xff] %v1187_v31  }
 0x1ea PF: > { %s13_s12 = sadd.s32 1, %s1382_s12  }
 0x1eb   : > { %p10_p4 = scmp.ge.s32.totalorder %s13_s12, 4  }
 0x1ed   :  { %12 = sbr.rel (!%p10_p4) target bundleno = 1 (0x1), region = 62 }

// kernel: encoder_forward.3
= control target key start
LH: loop header
LB: loop body
LE: loop exit
PB: predicated region body
PF: predicated region fallthrough
CT: control target
= control target key end

     0   :  { %v937_v28 = vlaneseq  ;;  %v6699_v36 = vmov 1966171168   ;;  %s8189_s0 = inlined_call_operand.vmem [shape: bf16[2,7168], index: 0, kind: input, shape index: {}]   ;;  %s8190_s1 = inlined_call_operand.vmem [shape: bf16[7168,128], index: 1, kind: input, shape index: {}]   ;;  %s8191_s2 = inlined_call_operand.vmem [shape: f32[1,128], index: 2, kind: input, shape index: {}]   ;;  %s8192_s3 = inlined_call_operand.hbm [shape: f32[2,128], index: 3, kind: output, shape index: {}]  }
   0x1   :  { %v6222_v0 = vld [vmem:[%s8190_s1 + $0x78] sm:$0xff]   ;;  %v6226_v4 = vld [vmem:[%s8190_s1 + $0x70] sm:$0xff]   ;;  %v6230_v8 = vld [vmem:[%s8190_s1 + $0x68] sm:$0xff]   ;;  %v935_v37 = vunpack.c.l.s4 %v6699_v36 }
   0x2   :  { %v6223_v1 = vld [vmem:[%s8190_s1 + $0xf8] sm:$0xff]   ;;  %5604 = vmatprep.subr.bf16.mxu0 %v6222_v0  ;;  %v6227_v5 = vld [vmem:[%s8190_s1 + $0xf0] sm:$0xff]   ;;  %v6231_v9 = vld [vmem:[%s8190_s1 + $0xe8] sm:$0xff]   ;;  %v938_v33 = vshrl.u32 %v937_v28, 7 }
   0x3   :  { %v6224_v2 = vld [vmem:[%s8190_s1 + $0x38] sm:$0xff]   ;;  %5626 = vmatprep.subr.bf16.mxu1 %v6223_v1  ;;  %v6228_v6 = vld [vmem:[%s8190_s1 + $0x30] sm:$0xff]   ;;  %v6232_v10 = vld [vmem:[%s8190_s1 + $0x28] sm:$0xff]   ;;  %v936_v40 = vunpack.c.0.s8 %v935_v37 }
   0x4   :  { %v6225_v3 = vld [vmem:[%s8190_s1 + $0xb8] sm:$0xff]   ;;  %5605 = vmatpush3.bf16.msra.mxu0 %v6224_v2  ;;  %v6229_v7 = vld [vmem:[%s8190_s1 + $0xb0] sm:$0xff]   ;;  %v6233_v11 = vld [vmem:[%s8190_s1 + $0xa8] sm:$0xff]  }
   0x5   :  { %5627 = vmatpush3.bf16.msra.mxu1 %v6225_v3  ;;  %5606 = vmatprep.subr.bf16.mxu0 %v6226_v4  ;;  %v6234_v12 = vld [vmem:[%s8190_s1 + $0x60] sm:$0xff]   ;;  %v6238_v16 = vld [vmem:[%s8190_s1 + $0x58] sm:$0xff]   ;;  %v6242_v20 = vld [vmem:[%s8190_s1 + $0x50] sm:$0xff]   ;;  %v6826_v41 = vsub.s32 %v936_v40, %v938_v33 }
   0x6   :  { %5628 = vmatprep.subr.bf16.mxu1 %v6227_v5  ;;  %v6235_v13 = vld [vmem:[%s8190_s1 + $0xe0] sm:$0xff]   ;;  %v6239_v17 = vld [vmem:[%s8190_s1 + $0xd8] sm:$0xff]   ;;  %v6243_v21 = vld [vmem:[%s8190_s1 + $0xd0] sm:$0xff]  }
   0x7   :  { %v6236_v14 = vld [vmem:[%s8190_s1 + $0x20] sm:$0xff]   ;;  %v6240_v18 = vld [vmem:[%s8190_s1 + $0x18] sm:$0xff]   ;;  %v6244_v22 = vld [vmem:[%s8190_s1 + $0x10] sm:$0xff]  }
   0x8   :  { %5607 = vmatpush3.bf16.msra.mxu0 %v6228_v6  ;;  %v6237_v15 = vld [vmem:[%s8190_s1 + $0xa0] sm:$0xff]   ;;  %v6241_v19 = vld [vmem:[%s8190_s1 + $0x98] sm:$0xff]   ;;  %v6245_v23 = vld [vmem:[%s8190_s1 + $0x90] sm:$0xff]  }
   0x9   :  { %5629 = vmatpush3.bf16.msra.mxu1 %v6229_v7  ;;  %5608 = vmatprep.subr.bf16.mxu0 %v6230_v8  ;;  %v6246_v24 = vld [vmem:[%s8190_s1 + $0x48] sm:$0xff]   ;;  %v6250_v29 = vld [vmem:[%s8190_s1 + $0x40] sm:$0xff]   ;;  %v6255_v35 = vld [vmem:[%s8190_s1 + $0x178] sm:$0xff]  }
   0xa   :  { %5630 = vmatprep.subr.bf16.mxu1 %v6231_v9  ;;  %v6247_v25 = vld [vmem:[%s8190_s1 + $0xc8] sm:$0xff]   ;;  %v6251_v30 = vld [vmem:[%s8190_s1 + $0xc0] sm:$0xff]   ;;  %v6256_v38 = vld [vmem:[%s8190_s1 + $0x1f8] sm:$0xff]  }
   0xb   :  { %v6248_v26 = vld [vmem:[%s8190_s1 + $0x8] sm:$0xff]   ;;  %v6252_v31 = vld [vmem:[%s8190_s1] sm:$0xff]   ;;  %v6257_v47 = vld [vmem:[%s8190_s1 + $0x138] sm:$0xff]  }
   0xc   :  { %5609 = vmatpush3.bf16.msra.mxu0 %v6232_v10  ;;  %v6249_v27 = vld [vmem:[%s8190_s1 + $0x88] sm:$0xff]   ;;  %v6253_v32 = vld [vmem:[%s8190_s1 + $0x80] sm:$0xff]   ;;  %v6258_v49 = vld [vmem:[%s8190_s1 + $0x1b8] sm:$0xff]  }
   0xd   :  { %5631 = vmatpush3.bf16.msra.mxu1 %v6233_v11  ;;  %5610 = vmatprep.subr.bf16.mxu0 %v6234_v12  ;;  %v16_v34 = vld [vmem:[%s8189_s0] sm:$0xff]  ;;  %v6259_v52 = vld [vmem:[%s8190_s1 + $0x170] sm:$0xff]   ;;  %v6263_v58 = vld [vmem:[%s8190_s1 + $0x168] sm:$0xff]  }
   0xe   :  { %5632 = vmatprep.subr.bf16.mxu1 %v6235_v13  ;;  %v933_v39 = vcombine.high %v16_v34, %v16_v34  ;;  %v940_v42 = vrot.slane %v16_v34, %v6826_v41  ;;  %v6260_v54 = vld [vmem:[%s8190_s1 + $0x1f0] sm:$0xff]   ;;  %v6264_v59 = vld [vmem:[%s8190_s1 + $0x1e8] sm:$0xff]   ;;  %v6267_v62 = vld [vmem:[%s8190_s1 + $0x160] sm:$0xff]  }
   0xf   :  { %v6261_v55 = vld [vmem:[%s8190_s1 + $0x130] sm:$0xff]   ;;  %v6265_v60 = vld [vmem:[%s8190_s1 + $0x128] sm:$0xff]   ;;  %v6268_v63 = vld [vmem:[%s8190_s1 + $0x1e0] sm:$0xff]  }
  0x10   :  { %5611 = vmatpush3.bf16.msra.mxu0 %v6236_v14  ;;  %v6830_v43 = vrot.slane %v933_v39, %v6826_v41  ;;  %v948_v44 = vcombine.high %v940_v42, %v940_v42  ;;  %v956_v45 = vrot.slane %v940_v42, %v6826_v41  ;;  %v6262_v57 = vld [vmem:[%s8190_s1 + $0x1b0] sm:$0xff]   ;;  %v6266_v61 = vld [vmem:[%s8190_s1 + $0x1a8] sm:$0xff]   ;;  %v6269_v0 = vld [vmem:[%s8190_s1 + $0x120] sm:$0xff]  }
  0x11   :  { %5633 = vmatpush3.bf16.msra.mxu1 %v6237_v15  ;;  %5612 = vmatprep.subr.bf16.mxu0 %v6238_v16  ;;  %v6270_v1 = vld [vmem:[%s8190_s1 + $0x1a0] sm:$0xff]   ;;  %v6271_v2 = vld [vmem:[%s8190_s1 + $0x158] sm:$0xff]   ;;  %v6275_v6 = vld [vmem:[%s8190_s1 + $0x150] sm:$0xff]  }
  0x12   :  { %5634 = vmatprep.subr.bf16.mxu1 %v6239_v17  ;;  %v949_v46 = vcombine.high %v6830_v43, %v6830_v43  ;;  %v970_v48 = vrot.slane %v948_v44, %v6826_v41  ;;  %v978_v51 = vcombine.high %v956_v45, %v956_v45  ;;  %v6272_v3 = vld [vmem:[%s8190_s1 + $0x1d8] sm:$0xff]   ;;  %v6276_v7 = vld [vmem:[%s8190_s1 + $0x1d0] sm:$0xff]   ;;  %v6279_v10 = vld [vmem:[%s8190_s1 + $0x148] sm:$0xff]  }
  0x13   :  { %v6273_v4 = vld [vmem:[%s8190_s1 + $0x118] sm:$0xff]   ;;  %v6277_v8 = vld [vmem:[%s8190_s1 + $0x110] sm:$0xff]   ;;  %v6280_v11 = vld [vmem:[%s8190_s1 + $0x1c8] sm:$0xff]  }
  0x14   :  { %5613 = vmatpush3.bf16.msra.mxu0 %v6240_v18  ;;  %v977_v50 = vrot.slane %v949_v46, %v6826_v41  ;;  %4052 = vmatprep.mubr.bf16.mxu0 %v970_v48  ;;  %v980_v53 = vcombine.high %v970_v48, %v970_v48  ;;  %v6274_v5 = vld [vmem:[%s8190_s1 + $0x198] sm:$0xff]   ;;  %v6278_v9 = vld [vmem:[%s8190_s1 + $0x190] sm:$0xff]   ;;  %v6281_v12 = vld [vmem:[%s8190_s1 + $0x108] sm:$0xff]   ;;  %v963_v18 = vrot.slane %v6830_v43, %v6826_v41 }
  0x15   :  { %5635 = vmatpush3.bf16.msra.mxu1 %v6241_v19  ;;  %5614 = vmatprep.subr.bf16.mxu0 %v6242_v20  ;;  %v6282_v13 = vld [vmem:[%s8190_s1 + $0x188] sm:$0xff]   ;;  %v6283_v14 = vld [vmem:[%s8190_s1 + $0x140] sm:$0xff]   ;;  %v6287_v19 = vld [vmem:[%s8190_s1 + $0x278] sm:$0xff]  }
  0x16   :  { %5636 = vmatprep.subr.bf16.mxu1 %v6243_v21  ;;  %v981_v56 = vcombine.high %v977_v50, %v977_v50  ;;  %4092 = vmatprep.mubr.bf16.mxu1 %v980_v53  ;;  %v6284_v15 = vld [vmem:[%s8190_s1 + $0x1c0] sm:$0xff]   ;;  %v6288_v20 = vld [vmem:[%s8190_s1 + $0x2f8] sm:$0xff]   ;;  %v6295_v28 = vld [vmem:[%s8190_s1 + $0x268] sm:$0xff]  }
  0x17   :  { %v6285_v16 = vld [vmem:[%s8190_s1 + $0x100] sm:$0xff]   ;;  %v6289_v21 = vld [vmem:[%s8190_s1 + $0x238] sm:$0xff]   ;;  %v6307_v40 = vld [vmem:[%s8190_s1 + $0x250] sm:$0xff]  }
  0x18   :  { %5615 = vmatpush3.bf16.msra.mxu0 %v6244_v22  ;;  %v6286_v17 = vld [vmem:[%s8190_s1 + $0x180] sm:$0xff]   ;;  %v6290_v22 = vld [vmem:[%s8190_s1 + $0x2b8] sm:$0xff]   ;;  %v6308_v42 = vld [vmem:[%s8190_s1 + $0x2d0] sm:$0xff]  }
  0x19   :  { %5637 = vmatpush3.bf16.msra.mxu1 %v6245_v23  ;;  %5616 = vmatprep.subr.bf16.mxu0 %v6246_v24  ;;  %v979_v23 = vcombine.high %v963_v18, %v963_v18  ;;  %v6291_v24 = vld [vmem:[%s8190_s1 + $0x270] sm:$0xff]   ;;  %v6300_v33 = vld [vmem:[%s8190_s1 + $0x2e0] sm:$0xff]   ;;  %v6303_v36 = vld [vmem:[%s8190_s1 + $0x258] sm:$0xff]  }
  0x1a   :  { %5638 = vmatprep.subr.bf16.mxu1 %v6247_v25  ;;  %v6292_v25 = vld [vmem:[%s8190_s1 + $0x2f0] sm:$0xff]   ;;  %v6301_v34 = vld [vmem:[%s8190_s1 + $0x220] sm:$0xff]   ;;  %v6304_v37 = vld [vmem:[%s8190_s1 + $0x2d8] sm:$0xff]  }
  0x1b   :  { %v6306_v39 = vld [vmem:[%s8190_s1 + $0x298] sm:$0xff]   ;;  %v6309_v43 = vld [vmem:[%s8190_s1 + $0x210] sm:$0xff]   ;;  %v17_v46 = vld [vmem:[%s8189_s0 + $0x8] sm:$0xff] }
  0x1c   :  { %5617 = vmatpush3.bf16.msra.mxu0 %v6248_v26  ;;  %v6293_v26 = vld [vmem:[%s8190_s1 + $0x230] sm:$0xff]   ;;  %v989_v48 = vrot.slane %v17_v46, %v6826_v41 }
  0x1d   :  { %5639 = vmatpush3.bf16.msra.mxu1 %v6249_v27  ;;  %5618 = vmatprep.subr.bf16.mxu0 %v6250_v29  ;;  %v6294_v27 = vld [vmem:[%s8190_s1 + $0x2b0] sm:$0xff]   ;;  %v6296_v29 = vld [vmem:[%s8190_s1 + $0x2e8] sm:$0xff]  }
  0x1e   :  { %5640 = vmatprep.subr.bf16.mxu1 %v6251_v30  ;;  %v6297_v30 = vld [vmem:[%s8190_s1 + $0x228] sm:$0xff]   ;;  %v6310_v44 = vld [vmem:[%s8190_s1 + $0x290] sm:$0xff]  }
  0x20   :  { %5619 = vmatpush3.bf16.msra.mxu0 %v6252_v31  ;;  %v6298_v31 = vld [vmem:[%s8190_s1 + $0x2a8] sm:$0xff]  }
  0x21   :  { %5641 = vmatpush3.bf16.msra.mxu1 %v6253_v32  ;;  %5648 = vmatprep.subr.bf16.mxu0 %v6255_v35  ;;  %v6299_v32 = vld [vmem:[%s8190_s1 + $0x260] sm:$0xff]  }
  0x22   :  { %5670 = vmatprep.subr.bf16.mxu1 %v6256_v38  ;;  %v6302_v35 = vld [vmem:[%s8190_s1 + $0x2a0] sm:$0xff]   ;;  %v6305_v38 = vld [vmem:[%s8190_s1 + $0x218] sm:$0xff]  }
  0x23   :  { %4053 = vmatmul.mubr.bf16.vlgmr.msra.gmra.mxu0 %v956_v45  ;;  %v6311_v45 = vld [vmem:[%s8190_s1 + $0x248] sm:$0xff]  }
  0x24   :  { %5649 = vmatpush3.bf16.msra.mxu0 %v6257_v47  ;;  %4093 = vmatmul.mubr.bf16.vlgmr.msra.gmra.mxu1 %v978_v51  ;;  %v6312_v47 = vld [vmem:[%s8190_s1 + $0x2c8] sm:$0xff]  }
  0x25   :  { %5650 = vmatprep.subr.bf16.mxu0 %v6259_v52  ;;  %5671 = vmatpush3.bf16.msra.mxu1 %v6258_v49  ;;  %v982_v49 = vcombine.high %v17_v46, %v17_v46  ;;  %v6314_v51 = vld [vmem:[%s8190_s1 + $0x288] sm:$0xff]   ;;  %v997_v52 = vcombine.high %v989_v48, %v989_v48 }
  0x26   :  { %4132 = vmatprep.mubr.bf16.mxu0 %v977_v50  ;;  %5672 = vmatprep.subr.bf16.mxu1 %v6260_v54  ;;  %v6313_v50 = vld [vmem:[%s8190_s1 + $0x208] sm:$0xff]   ;;  %v6315_v54 = vld [vmem:[%s8190_s1 + $0x240] sm:$0xff]  }
  0x27   :  { %4172 = vmatprep.mubr.bf16.mxu1 %v981_v56  ;;  %v7018_v53 = vrot.slane %v982_v49, %v6826_v41  ;;  %v1019_v56 = vrot.slane %v997_v52, %v6826_v41  ;;  %v6362_v46 = vld [vmem:[%s8190_s1 + $0x428] sm:$0xff]   ;;  %v6365_v49 = vld [vmem:[%s8190_s1 + $0x4e0] sm:$0xff]   ;;  %v6368_v52 = vld [vmem:[%s8190_s1 + $0x458] sm:$0xff]  }
  0x28   :  { %5651 = vmatpush3.bf16.msra.mxu0 %v6261_v55  ;;  %v6316_v55 = vld [vmem:[%s8190_s1 + $0x2c0] sm:$0xff]  }
  0x29   :  { %5652 = vmatprep.subr.bf16.mxu0 %v6263_v58  ;;  %5673 = vmatpush3.bf16.msra.mxu1 %v6262_v57  ;;  %v998_v57 = vcombine.high %v7018_v53, %v7018_v53  ;;  %v6317_v58 = vld [vmem:[%s8190_s1 + $0x200] sm:$0xff]  }
  0x2a   :  { %5674 = vmatprep.subr.bf16.mxu1 %v6264_v59  ;;  %v6318_v59 = vld [vmem:[%s8190_s1 + $0x280] sm:$0xff]  }
  0x2c   :  { %5653 = vmatpush3.bf16.msra.mxu0 %v6265_v60  ;;  %v1029_v60 = vcombine.high %v1019_v56, %v1019_v56 }
  0x2d   :  { %5654 = vmatprep.subr.bf16.mxu0 %v6267_v62  ;;  %5675 = vmatpush3.bf16.msra.mxu1 %v6266_v61  ;;  %v1005_v61 = vrot.slane %v989_v48, %v6826_v41  ;;  %v6319_v62 = vld [vmem:[%s8190_s1 + $0x378] sm:$0xff]   ;;  %v6364_v48 = vld [vmem:[%s8190_s1 + $0x460] sm:$0xff]  }
  0x2e   :  { %5676 = vmatprep.subr.bf16.mxu1 %v6268_v63  ;;  %v6320_v63 = vld [vmem:[%s8190_s1 + $0x3f8] sm:$0xff]  }
  0x30   :  { %5655 = vmatpush3.bf16.msra.mxu0 %v6269_v0  ;;  %v1026_v0 = vrot.slane %v998_v57, %v6826_v41  ;;  %v6373_v57 = vld [vmem:[%s8190_s1 + $0x4d0] sm:$0xff]  }
  0x31   :  { %5656 = vmatprep.subr.bf16.mxu0 %v6271_v2  ;;  %5677 = vmatpush3.bf16.msra.mxu1 %v6270_v1  ;;  %v6321_v1 = vld [vmem:[%s8190_s1 + $0x338] sm:$0xff]  }
  0x32   :  { %5678 = vmatprep.subr.bf16.mxu1 %v6272_v3  ;;  %v6322_v2 = vld [vmem:[%s8190_s1 + $0x3b8] sm:$0xff]   ;;  %v1027_v3 = vcombine.high %v1005_v61, %v1005_v61 }
  0x34   :  { %5657 = vmatpush3.bf16.msra.mxu0 %v6273_v4  ;;  %v6323_v4 = vld [vmem:[%s8190_s1 + $0x370] sm:$0xff]  }
  0x35   :  { %5658 = vmatprep.subr.bf16.mxu0 %v6275_v6  ;;  %5679 = vmatpush3.bf16.msra.mxu1 %v6274_v5  ;;  %v6324_v5 = vld [vmem:[%s8190_s1 + $0x3f0] sm:$0xff]   ;;  %v1030_v6 = vcombine.high %v1026_v0, %v1026_v0 }
  0x36   :  { %5680 = vmatprep.subr.bf16.mxu1 %v6276_v7  ;;  %v6325_v7 = vld [vmem:[%s8190_s1 + $0x330] sm:$0xff]  }
  0x38   :  { %5659 = vmatpush3.bf16.msra.mxu0 %v6277_v8  ;;  %v6326_v8 = vld [vmem:[%s8190_s1 + $0x3b0] sm:$0xff]  }
  0x39   :  { %5660 = vmatprep.subr.bf16.mxu0 %v6279_v10  ;;  %5681 = vmatpush3.bf16.msra.mxu1 %v6278_v9  ;;  %v6327_v9 = vld [vmem:[%s8190_s1 + $0x368] sm:$0xff]  }
  0x3a   :  { %5682 = vmatprep.subr.bf16.mxu1 %v6280_v11  ;;  %v6328_v10 = vld [vmem:[%s8190_s1 + $0x3e8] sm:$0xff]  }
  0x3b   :  { %v6329_v11 = vld [vmem:[%s8190_s1 + $0x328] sm:$0xff]  }
  0x3c   :  { %5661 = vmatpush3.bf16.msra.mxu0 %v6281_v12  ;;  %v6330_v12 = vld [vmem:[%s8190_s1 + $0x3a8] sm:$0xff]  }
  0x3d   :  { %5662 = vmatprep.subr.bf16.mxu0 %v6283_v14  ;;  %5683 = vmatpush3.bf16.msra.mxu1 %v6282_v13  ;;  %v6331_v13 = vld [vmem:[%s8190_s1 + $0x360] sm:$0xff]  }
  0x3e   :  { %5684 = vmatprep.subr.bf16.mxu1 %v6284_v15  ;;  %v6332_v14 = vld [vmem:[%s8190_s1 + $0x3e0] sm:$0xff]  }
  0x3f   :  { %v6333_v15 = vld [vmem:[%s8190_s1 + $0x320] sm:$0xff]  }
  0x40   :  { %5663 = vmatpush3.bf16.msra.mxu0 %v6285_v16  ;;  %v6334_v16 = vld [vmem:[%s8190_s1 + $0x3a0] sm:$0xff]  }
  0x41   :  { %5692 = vmatprep.subr.bf16.mxu0 %v6287_v19  ;;  %5685 = vmatpush3.bf16.msra.mxu1 %v6286_v17  ;;  %v6335_v17 = vld [vmem:[%s8190_s1 + $0x358] sm:$0xff]  }
  0x42   :  { %5714 = vmatprep.subr.bf16.mxu1 %v6288_v20  ;;  %v6337_v19 = vld [vmem:[%s8190_s1 + $0x318] sm:$0xff]  }
  0x43   :  { %4133 = vmatmul.mubr.bf16.vlgmr.msra.gmra.mxu0 %v963_v18  ;;  %v6336_v18 = vld [vmem:[%s8190_s1 + $0x3d8] sm:$0xff]  }
  0x44   :  { %5693 = vmatpush3.bf16.msra.mxu0 %v6289_v21  ;;  %4173 = vmatmul.mubr.bf16.vlgmr.msra.gmra.mxu1 %v979_v23  ;;  %v6338_v20 = vld [vmem:[%s8190_s1 + $0x398] sm:$0xff]   ;;  %v6339_v21 = vld [vmem:[%s8190_s1 + $0x350] sm:$0xff]  }
  0x45   :  { %5694 = vmatprep.subr.bf16.mxu0 %v6291_v24  ;;  %5715 = vmatpush3.bf16.msra.mxu1 %v6290_v22  ;;  %v6340_v22 = vld [vmem:[%s8190_s1 + $0x3d0] sm:$0xff]  }
  0x46   :  { %5716 = vmatprep.subr.bf16.mxu1 %v6292_v25  ;;  %4212 = vmatprep.mubr.bf16.mxu0 %v1019_v56  ;;  %v6341_v23 = vld [vmem:[%s8190_s1 + $0x310] sm:$0xff]   ;;  %v6343_v25 = vld [vmem:[%s8190_s1 + $0x348] sm:$0xff]  }
  0x47   :  { %4252 = vmatprep.mubr.bf16.mxu1 %v1029_v60  ;;  %v6342_v24 = vld [vmem:[%s8190_s1 + $0x390] sm:$0xff]   ;;  %v6376_v60 = vld [vmem:[%s8190_s1 + $0x448] sm:$0xff]  }
  0x48   :  { %5695 = vmatpush3.bf16.msra.mxu0 %v6293_v26  ;;  %v6344_v26 = vld [vmem:[%s8190_s1 + $0x3c8] sm:$0xff]   ;;  %v6372_v56 = vld [vmem:[%s8190_s1 + $0x450] sm:$0xff]  }
  0x49   :  { %5696 = vmatprep.subr.bf16.mxu0 %v6295_v28  ;;  %5717 = vmatpush3.bf16.msra.mxu1 %v6294_v27  ;;  %v6345_v27 = vld [vmem:[%s8190_s1 + $0x308] sm:$0xff]  }
  0x4a   :  { %5718 = vmatprep.subr.bf16.mxu1 %v6296_v29  ;;  %v6346_v28 = vld [vmem:[%s8190_s1 + $0x388] sm:$0xff]   ;;  %v6347_v29 = vld [vmem:[%s8190_s1 + $0x340] sm:$0xff]  }
  0x4c   :  { %5697 = vmatpush3.bf16.msra.mxu0 %v6297_v30  ;;  %v6348_v30 = vld [vmem:[%s8190_s1 + $0x3c0] sm:$0xff]  }
  0x4d   :  { %5698 = vmatprep.subr.bf16.mxu0 %v6299_v32  ;;  %5719 = vmatpush3.bf16.msra.mxu1 %v6298_v31  ;;  %v6349_v31 = vld [vmem:[%s8190_s1 + $0x300] sm:$0xff]  }
  0x4e   :  { %5720 = vmatprep.subr.bf16.mxu1 %v6300_v33  ;;  %v6350_v32 = vld [vmem:[%s8190_s1 + $0x380] sm:$0xff]   ;;  %v1012_v33 = vrot.slane %v7018_v53, %v6826_v41  ;;  %v6369_v53 = vld [vmem:[%s8190_s1 + $0x4d8] sm:$0xff]  }
  0x50   :  { %5699 = vmatpush3.bf16.msra.mxu0 %v6301_v34  ;;  %v6352_v34 = vld [vmem:[%s8190_s1 + $0x478] sm:$0xff]  }
  0x51   :  { %5700 = vmatprep.subr.bf16.mxu0 %v6303_v36  ;;  %5721 = vmatpush3.bf16.msra.mxu1 %v6302_v35  ;;  %v6353_v35 = vld [vmem:[%s8190_s1 + $0x4f8] sm:$0xff]  }
  0x52   :  { %5722 = vmatprep.subr.bf16.mxu1 %v6304_v37  ;;  %v6354_v36 = vld [vmem:[%s8190_s1 + $0x438] sm:$0xff]  }
  0x53   :  { %v6355_v37 = vld [vmem:[%s8190_s1 + $0x4b8] sm:$0xff]  }
  0x54   :  { %5701 = vmatpush3.bf16.msra.mxu0 %v6305_v38  ;;  %v1028_v38 = vcombine.high %v1012_v33, %v1012_v33 }
  0x55   :  { %5702 = vmatprep.subr.bf16.mxu0 %v6307_v40  ;;  %5723 = vmatpush3.bf16.msra.mxu1 %v6306_v39  ;;  %v6356_v39 = vld [vmem:[%s8190_s1 + $0x470] sm:$0xff]  }
  0x56   :  { %5724 = vmatprep.subr.bf16.mxu1 %v6308_v42  ;;  %v6357_v40 = vld [vmem:[%s8190_s1 + $0x4f0] sm:$0xff]  }
  0x57   :  { %v6358_v42 = vld [vmem:[%s8190_s1 + $0x430] sm:$0xff]  }
  0x58   :  { %5703 = vmatpush3.bf16.msra.mxu0 %v6309_v43  ;;  %v6359_v43 = vld [vmem:[%s8190_s1 + $0x4b0] sm:$0xff]  }
  0x59   :  { %5704 = vmatprep.subr.bf16.mxu0 %v6311_v45  ;;  %5725 = vmatpush3.bf16.msra.mxu1 %v6310_v44  ;;  %v6360_v44 = vld [vmem:[%s8190_s1 + $0x468] sm:$0xff]  }
  0x5a   :  { %5726 = vmatprep.subr.bf16.mxu1 %v6312_v47  ;;  %v6361_v45 = vld [vmem:[%s8190_s1 + $0x4e8] sm:$0xff]  }
  0x5b   :  { %v6363_v47 = vld [vmem:[%s8190_s1 + $0x4a8] sm:$0xff]  }
  0x5c   :  { %5705 = vmatpush3.bf16.msra.mxu0 %v6313_v50  ;;  %v6366_v50 = vld [vmem:[%s8190_s1 + $0x420] sm:$0xff]  }
  0x5d   :  { %5706 = vmatprep.subr.bf16.mxu0 %v6315_v54  ;;  %5727 = vmatpush3.bf16.msra.mxu1 %v6314_v51  ;;  %v6367_v51 = vld [vmem:[%s8190_s1 + $0x4a0] sm:$0xff]   ;;  %v6370_v54 = vld [vmem:[%s8190_s1 + $0x418] sm:$0xff]  }
  0x5e   :  { %5728 = vmatprep.subr.bf16.mxu1 %v6316_v55  ;;  %v6371_v55 = vld [vmem:[%s8190_s1 + $0x498] sm:$0xff]  }
  0x60   :  { %5707 = vmatpush3.bf16.msra.mxu0 %v6317_v58  ;;  %v6374_v58 = vld [vmem:[%s8190_s1 + $0x410] sm:$0xff]  }
  0x61   :  { %5736 = vmatprep.subr.bf16.mxu0 %v6319_v62  ;;  %5729 = vmatpush3.bf16.msra.mxu1 %v6318_v59  ;;  %v6375_v59 = vld [vmem:[%s8190_s1 + $0x490] sm:$0xff]   ;;  %v6377_v62 = vld [vmem:[%s8190_s1 + $0x4c8] sm:$0xff]  }
  0x62   :  { %5758 = vmatprep.subr.bf16.mxu1 %v6320_v63 }
  0x63   :  { %4213 = vmatmul.mubr.bf16.vlgmr.msra.gmra.mxu0 %v1005_v61  ;;  %v18_v61 = vld [vmem:[%s8189_s0 + $0x10] sm:$0xff] }
  0x64   :  { %5737 = vmatpush3.bf16.msra.mxu0 %v6321_v1  ;;  %4292 = vmatprep.mubr.bf16.mxu0 %v1026_v0  ;;  %v1038_v63 = vrot.slane %v18_v61, %v6826_v41  ;;  %v1031_v0 = vcombine.high %v18_v61, %v18_v61  ;;  %v6378_v1 = vld [vmem:[%s8190_s1 + $0x408] sm:$0xff]  }
  0x65   :  { %4253 = vmatmul.mubr.bf16.vlgmr.msra.gmra.mxu1 %v1027_v3  ;;  %5738 = vmatprep.subr.bf16.mxu0 %v6323_v4  ;;  %v6427_v61 = vld [vmem:[%s8190_s1 + $0x628] sm:$0xff]  }
  0x66   :  { %5759 = vmatpush3.bf16.msra.mxu1 %v6322_v2  ;;  %4332 = vmatprep.mubr.bf16.mxu1 %v1030_v6  ;;  %v6379_v2 = vld [vmem:[%s8190_s1 + $0x488] sm:$0xff]   ;;  %v1046_v3 = vcombine.high %v1038_v63, %v1038_v63  ;;  %v7224_v4 = vrot.slane %v1031_v0, %v6826_v41  ;;  %v6381_v6 = vld [vmem:[%s8190_s1 + $0x4c0] sm:$0xff]  }
  0x67   :  { %5760 = vmatprep.subr.bf16.mxu1 %v6324_v5  ;;  %v6380_v5 = vld [vmem:[%s8190_s1 + $0x440] sm:$0xff]  }
  0x68   :  { %5739 = vmatpush3.bf16.msra.mxu0 %v6325_v7  ;;  %v1068_v7 = vrot.slane %v1046_v3, %v6826_v41  ;;  %v6430_v0 = vld [vmem:[%s8190_s1 + $0x6e0] sm:$0xff]   ;;  %v6433_v3 = vld [vmem:[%s8190_s1 + $0x658] sm:$0xff]  }
  0x69   :  { %5740 = vmatprep.subr.bf16.mxu0 %v6327_v9  ;;  %v6382_v9 = vld [vmem:[%s8190_s1 + $0x400] sm:$0xff]  }
  0x6a   :  { %5761 = vmatpush3.bf16.msra.mxu1 %v6326_v8  ;;  %v1047_v8 = vcombine.high %v7224_v4, %v7224_v4 }
  0x6b   :  { %5762 = vmatprep.subr.bf16.mxu1 %v6328_v10  ;;  %v6383_v10 = vld [vmem:[%s8190_s1 + $0x480] sm:$0xff]  }
  0x6c   :  { %5741 = vmatpush3.bf16.msra.mxu0 %v6329_v11  ;;  %v1078_v11 = vcombine.high %v1068_v7, %v1068_v7 }
  0x6d   :  { %5742 = vmatprep.subr.bf16.mxu0 %v6331_v13  ;;  %v6384_v13 = vld [vmem:[%s8190_s1 + $0x578] sm:$0xff]  }
  0x6e   :  { %5763 = vmatpush3.bf16.msra.mxu1 %v6330_v12  ;;  %v1054_v12 = vrot.slane %v1038_v63, %v6826_v41  ;;  %v6429_v63 = vld [vmem:[%s8190_s1 + $0x660] sm:$0xff]  }
  0x6f   :  { %5764 = vmatprep.subr.bf16.mxu1 %v6332_v14  ;;  %v6385_v14 = vld [vmem:[%s8190_s1 + $0x5f8] sm:$0xff]  }
  0x70   :  { %5743 = vmatpush3.bf16.msra.mxu0 %v6333_v15  ;;  %v1075_v15 = vrot.slane %v1047_v8, %v6826_v41  ;;  %v6438_v8 = vld [vmem:[%s8190_s1 + $0x6d0] sm:$0xff]  }
  0x71   :  { %5744 = vmatprep.subr.bf16.mxu0 %v6335_v17  ;;  %v6387_v17 = vld [vmem:[%s8190_s1 + $0x5b8] sm:$0xff]  }
  0x72   :  { %5765 = vmatpush3.bf16.msra.mxu1 %v6334_v16  ;;  %v6386_v16 = vld [vmem:[%s8190_s1 + $0x538] sm:$0xff]  }
  0x73   :  { %5766 = vmatprep.subr.bf16.mxu1 %v6336_v18  ;;  %v1076_v18 = vcombine.high %v1054_v12, %v1054_v12 }
  0x74   :  { %5745 = vmatpush3.bf16.msra.mxu0 %v6337_v19  ;;  %v6388_v19 = vld [vmem:[%s8190_s1 + $0x570] sm:$0xff]  }
  0x75   :  { %5746 = vmatprep.subr.bf16.mxu0 %v6339_v21  ;;  %v1079_v21 = vcombine.high %v1075_v15, %v1075_v15 }
  0x76   :  { %5767 = vmatpush3.bf16.msra.mxu1 %v6338_v20  ;;  %v6389_v20 = vld [vmem:[%s8190_s1 + $0x5f0] sm:$0xff]  }
  0x77   :  { %5768 = vmatprep.subr.bf16.mxu1 %v6340_v22  ;;  %v6390_v22 = vld [vmem:[%s8190_s1 + $0x530] sm:$0xff]  }
  0x78   :  { %5747 = vmatpush3.bf16.msra.mxu0 %v6341_v23  ;;  %v6391_v23 = vld [vmem:[%s8190_s1 + $0x5b0] sm:$0xff]  }
  0x79   :  { %5748 = vmatprep.subr.bf16.mxu0 %v6343_v25  ;;  %v6393_v25 = vld [vmem:[%s8190_s1 + $0x5e8] sm:$0xff]  }
  0x7a   :  { %5769 = vmatpush3.bf16.msra.mxu1 %v6342_v24  ;;  %v6392_v24 = vld [vmem:[%s8190_s1 + $0x568] sm:$0xff]  }
  0x7b   :  { %5770 = vmatprep.subr.bf16.mxu1 %v6344_v26  ;;  %v6394_v26 = vld [vmem:[%s8190_s1 + $0x528] sm:$0xff]  }
  0x7c   :  { %5749 = vmatpush3.bf16.msra.mxu0 %v6345_v27  ;;  %v6395_v27 = vld [vmem:[%s8190_s1 + $0x5a8] sm:$0xff]  }
  0x7d   :  { %5750 = vmatprep.subr.bf16.mxu0 %v6347_v29  ;;  %v6397_v29 = vld [vmem:[%s8190_s1 + $0x5e0] sm:$0xff]  }
  0x7e   :  { %5771 = vmatpush3.bf16.msra.mxu1 %v6346_v28  ;;  %v6396_v28 = vld [vmem:[%s8190_s1 + $0x560] sm:$0xff]  }
  0x7f   :  { %5772 = vmatprep.subr.bf16.mxu1 %v6348_v30  ;;  %v6398_v30 = vld [vmem:[%s8190_s1 + $0x520] sm:$0xff]  }
  0x80   :  { %5751 = vmatpush3.bf16.msra.mxu0 %v6349_v31  ;;  %v6399_v31 = vld [vmem:[%s8190_s1 + $0x5a0] sm:$0xff]  }
  0x81   :  { %5780 = vmatprep.subr.bf16.mxu0 %v6352_v34  ;;  %v6402_v34 = vld [vmem:[%s8190_s1 + $0x518] sm:$0xff]  }
  0x82   :  { %5773 = vmatpush3.bf16.msra.mxu1 %v6350_v32  ;;  %v6400_v32 = vld [vmem:[%s8190_s1 + $0x558] sm:$0xff]  }
  0x83   :  { %4293 = vmatmul.mubr.bf16.vlgmr.msra.gmra.mxu0 %v1012_v33  ;;  %5802 = vmatprep.subr.bf16.mxu1 %v6353_v35  ;;  %v6401_v33 = vld [vmem:[%s8190_s1 + $0x5d8] sm:$0xff]  }
  0x84   :  { %5781 = vmatpush3.bf16.msra.mxu0 %v6354_v36  ;;  %4372 = vmatprep.mubr.bf16.mxu0 %v1068_v7  ;;  %v6403_v35 = vld [vmem:[%s8190_s1 + $0x598] sm:$0xff]   ;;  %v6404_v36 = vld [vmem:[%s8190_s1 + $0x550] sm:$0xff]  }
  0x85   :  { %4333 = vmatmul.mubr.bf16.vlgmr.msra.gmra.mxu1 %v1028_v38  ;;  %5782 = vmatprep.subr.bf16.mxu0 %v6356_v39  ;;  %v6406_v38 = vld [vmem:[%s8190_s1 + $0x510] sm:$0xff]  }
  0x86   :  { %5803 = vmatpush3.bf16.msra.mxu1 %v6355_v37  ;;  %4412 = vmatprep.mubr.bf16.mxu1 %v1078_v11  ;;  %v6405_v37 = vld [vmem:[%s8190_s1 + $0x5d0] sm:$0xff]   ;;  %v6441_v11 = vld [vmem:[%s8190_s1 + $0x648] sm:$0xff]  }
  0x87   :  { %5804 = vmatprep.subr.bf16.mxu1 %v6357_v40  ;;  %v6407_v39 = vld [vmem:[%s8190_s1 + $0x590] sm:$0xff]   ;;  %v6408_v40 = vld [vmem:[%s8190_s1 + $0x548] sm:$0xff]  }
  0x88   :  { %5783 = vmatpush3.bf16.msra.mxu0 %v6358_v42  ;;  %v6409_v42 = vld [vmem:[%s8190_s1 + $0x5c8] sm:$0xff]   ;;  %v6437_v7 = vld [vmem:[%s8190_s1 + $0x650] sm:$0xff]  }
  0x89   :  { %5784 = vmatprep.subr.bf16.mxu0 %v6360_v44  ;;  %v6411_v44 = vld [vmem:[%s8190_s1 + $0x588] sm:$0xff]  }
  0x8a   :  { %5805 = vmatpush3.bf16.msra.mxu1 %v6359_v43  ;;  %v6410_v43 = vld [vmem:[%s8190_s1 + $0x508] sm:$0xff]  }
  0x8b   :  { %5806 = vmatprep.subr.bf16.mxu1 %v6361_v45  ;;  %v6412_v45 = vld [vmem:[%s8190_s1 + $0x540] sm:$0xff]  }
  0x8c   :  { %5785 = vmatpush3.bf16.msra.mxu0 %v6362_v46  ;;  %v6413_v46 = vld [vmem:[%s8190_s1 + $0x5c0] sm:$0xff]  }
  0x8d   :  { %5786 = vmatprep.subr.bf16.mxu0 %v6364_v48  ;;  %v6415_v48 = vld [vmem:[%s8190_s1 + $0x580] sm:$0xff]  }
  0x8e   :  { %5807 = vmatpush3.bf16.msra.mxu1 %v6363_v47  ;;  %v6414_v47 = vld [vmem:[%s8190_s1 + $0x500] sm:$0xff]  }
  0x8f   :  { %5808 = vmatprep.subr.bf16.mxu1 %v6365_v49  ;;  %v1061_v49 = vrot.slane %v7224_v4, %v6826_v41  ;;  %v6434_v4 = vld [vmem:[%s8190_s1 + $0x6d8] sm:$0xff]  }
  0x90   :  { %5787 = vmatpush3.bf16.msra.mxu0 %v6366_v50  ;;  %v6417_v50 = vld [vmem:[%s8190_s1 + $0x678] sm:$0xff]  }
  0x91   :  { %5788 = vmatprep.subr.bf16.mxu0 %v6368_v52  ;;  %v6419_v52 = vld [vmem:[%s8190_s1 + $0x638] sm:$0xff]  }
  0x92   :  { %5809 = vmatpush3.bf16.msra.mxu1 %v6367_v51  ;;  %v6418_v51 = vld [vmem:[%s8190_s1 + $0x6f8] sm:$0xff]  }
  0x93   :  { %5810 = vmatprep.subr.bf16.mxu1 %v6369_v53  ;;  %v6420_v53 = vld [vmem:[%s8190_s1 + $0x6b8] sm:$0xff]  }
  0x94   :  { %5789 = vmatpush3.bf16.msra.mxu0 %v6370_v54  ;;  %v1077_v54 = vcombine.high %v1061_v49, %v1061_v49 }
  0x95   :  { %5790 = vmatprep.subr.bf16.mxu0 %v6372_v56  ;;  %v6422_v56 = vld [vmem:[%s8190_s1 + $0x6f0] sm:$0xff]  }
  0x96   :  { %5811 = vmatpush3.bf16.msra.mxu1 %v6371_v55  ;;  %v6421_v55 = vld [vmem:[%s8190_s1 + $0x670] sm:$0xff]  }
  0x97   :  { %5812 = vmatprep.subr.bf16.mxu1 %v6373_v57  ;;  %v6423_v57 = vld [vmem:[%s8190_s1 + $0x630] sm:$0xff]  }
  0x98   :  { %5791 = vmatpush3.bf16.msra.mxu0 %v6374_v58  ;;  %v6424_v58 = vld [vmem:[%s8190_s1 + $0x6b0] sm:$0xff]  }
  0x99   :  { %5792 = vmatprep.subr.bf16.mxu0 %v6376_v60  ;;  %v6426_v60 = vld [vmem:[%s8190_s1 + $0x6e8] sm:$0xff]  }
  0x9a   :  { %5813 = vmatpush3.bf16.msra.mxu1 %v6375_v59  ;;  %v6425_v59 = vld [vmem:[%s8190_s1 + $0x668] sm:$0xff]  }
  0x9b   :  { %5814 = vmatprep.subr.bf16.mxu1 %v6377_v62  ;;  %v6428_v62 = vld [vmem:[%s8190_s1 + $0x6a8] sm:$0xff]  }
  0x9c   :  { %5793 = vmatpush3.bf16.msra.mxu0 %v6378_v1  ;;  %v6431_v1 = vld [vmem:[%s8190_s1 + $0x620] sm:$0xff]  }
  0x9d   :  { %5794 = vmatprep.subr.bf16.mxu0 %v6380_v5  ;;  %v6435_v5 = vld [vmem:[%s8190_s1 + $0x618] sm:$0xff]  }
  0x9e   :  { %5815 = vmatpush3.bf16.msra.mxu1 %v6379_v2  ;;  %v6432_v2 = vld [vmem:[%s8190_s1 + $0x6a0] sm:$0xff]  }
  0x9f   :  { %5816 = vmatprep.subr.bf16.mxu1 %v6381_v6  ;;  %v6436_v6 = vld [vmem:[%s8190_s1 + $0x698] sm:$0xff]  }
  0xa0   :  { %5795 = vmatpush3.bf16.msra.mxu0 %v6382_v9  ;;  %v6439_v9 = vld [vmem:[%s8190_s1 + $0x610] sm:$0xff]  }
  0xa1   :  { %5824 = vmatprep.subr.bf16.mxu0 %v6384_v13  ;;  %v6442_v13 = vld [vmem:[%s8190_s1 + $0x6c8] sm:$0xff]  }
  0xa2   :  { %5817 = vmatpush3.bf16.msra.mxu1 %v6383_v10  ;;  %v6440_v10 = vld [vmem:[%s8190_s1 + $0x690] sm:$0xff]  }
  0xa3   :  { %4373 = vmatmul.mubr.bf16.vlgmr.msra.gmra.mxu0 %v1054_v12  ;;  %5846 = vmatprep.subr.bf16.mxu1 %v6385_v14  ;;  %v19_v12 = vld [vmem:[%s8189_s0 + $0x18] sm:$0xff] }
  0xa4   :  { %5825 = vmatpush3.bf16.msra.mxu0 %v6386_v16  ;;  %4452 = vmatprep.mubr.bf16.mxu0 %v1075_v15  ;;  %v1087_v14 = vrot.slane %v19_v12, %v6826_v41  ;;  %v1080_v15 = vcombine.high %v19_v12, %v19_v12  ;;  %v6443_v16 = vld [vmem:[%s8190_s1 + $0x608] sm:$0xff]   ;;  %v6480_v12 = vld [vmem:[%s8190_s1 + $0x780] sm:$0xff]  }
  0xa5   :  { %4413 = vmatmul.mubr.bf16.vlgmr.msra.gmra.mxu1 %v1076_v18  ;;  %5826 = vmatprep.subr.bf16.mxu0 %v6388_v19 }
  0xa6   :  { %5847 = vmatpush3.bf16.msra.mxu1 %v6387_v17  ;;  %4492 = vmatprep.mubr.bf16.mxu1 %v1079_v21  ;;  %v6445_v17 = vld [vmem:[%s8190_s1 + $0x640] sm:$0xff]   ;;  %v1095_v18 = vcombine.high %v1087_v14, %v1087_v14  ;;  %v7430_v19 = vrot.slane %v1080_v15, %v6826_v41  ;;  %v6483_v15 = vld [vmem:[%s8190_s1 + $0x8f8] sm:$0xff]  }
  0xa7   :  { %5848 = vmatprep.subr.bf16.mxu1 %v6389_v20  ;;  %v6444_v20 = vld [vmem:[%s8190_s1 + $0x688] sm:$0xff]   ;;  %v6446_v21 = vld [vmem:[%s8190_s1 + $0x6c0] sm:$0xff]  }
  0xa8   :  { %5827 = vmatpush3.bf16.msra.mxu0 %v6390_v22  ;;  %v6447_v22 = vld [vmem:[%s8190_s1 + $0x600] sm:$0xff]  }
  0xa9   :  { %5828 = vmatprep.subr.bf16.mxu0 %v6392_v24  ;;  %v1096_v24 = vcombine.high %v7430_v19, %v7430_v19 }
  0xaa   :  { %5849 = vmatpush3.bf16.msra.mxu1 %v6391_v23  ;;  %v1117_v23 = vrot.slane %v1095_v18, %v6826_v41 }
  0xab   :  { %5850 = vmatprep.subr.bf16.mxu1 %v6393_v25  ;;  %v6448_v25 = vld [vmem:[%s8190_s1 + $0x680] sm:$0xff]  }
  0xac   :  { %5829 = vmatpush3.bf16.msra.mxu0 %v6394_v26  ;;  %v1127_v26 = vcombine.high %v1117_v23, %v1117_v23 }
  0xad   :  { %5830 = vmatprep.subr.bf16.mxu0 %v6396_v28  ;;  %v6449_v28 = vld [vmem:[%s8190_s1 + $0x778] sm:$0xff]  }
  0xae   :  { %5851 = vmatpush3.bf16.msra.mxu1 %v6395_v27  ;;  %v1103_v27 = vrot.slane %v1087_v14, %v6826_v41  ;;  %v6482_v14 = vld [vmem:[%s8190_s1 + $0x878] sm:$0xff]  }
  0xaf   :  { %5852 = vmatprep.subr.bf16.mxu1 %v6397_v29  ;;  %v6450_v29 = vld [vmem:[%s8190_s1 + $0x7f8] sm:$0xff]  }
  0xb0   :  { %5831 = vmatpush3.bf16.msra.mxu0 %v6398_v30  ;;  %v1124_v30 = vrot.slane %v1096_v24, %v6826_v41 }
  0xb1   :  { %5832 = vmatprep.subr.bf16.mxu0 %v6400_v32  ;;  %v6452_v32 = vld [vmem:[%s8190_s1 + $0x7b8] sm:$0xff]  }
  0xb2   :  { %5853 = vmatpush3.bf16.msra.mxu1 %v6399_v31  ;;  %v6451_v31 = vld [vmem:[%s8190_s1 + $0x738] sm:$0xff]  }
  0xb3   :  { %5854 = vmatprep.subr.bf16.mxu1 %v6401_v33  ;;  %v1125_v33 = vcombine.high %v1103_v27, %v1103_v27 }
  0xb4   :  { %5833 = vmatpush3.bf16.msra.mxu0 %v6402_v34  ;;  %v6453_v34 = vld [vmem:[%s8190_s1 + $0x770] sm:$0xff]  }
  0xb5   :  { %5834 = vmatprep.subr.bf16.mxu0 %v6404_v36  ;;  %v1128_v36 = vcombine.high %v1124_v30, %v1124_v30 }
  0xb6   :  { %5855 = vmatpush3.bf16.msra.mxu1 %v6403_v35  ;;  %v6454_v35 = vld [vmem:[%s8190_s1 + $0x7f0] sm:$0xff]  }
  0xb7   :  { %5856 = vmatprep.subr.bf16.mxu1 %v6405_v37 }
  0xb8   :  { %5835 = vmatpush3.bf16.msra.mxu0 %v6406_v38  ;;  %v5155_v38 = vld [vmem:[%s8191_s2] ss:$0 sm:$0xff] }
  0xb9   :  { %5836 = vmatprep.subr.bf16.mxu0 %v6408_v40  ;;  %v6456_v40 = vld [vmem:[%s8190_s1 + $0x7b0] sm:$0xff]  }
  0xba   :  { %5857 = vmatpush3.bf16.msra.mxu1 %v6407_v39  ;;  %v6455_v39 = vld [vmem:[%s8190_s1 + $0x730] sm:$0xff]  }
  0xbb   :  { %5858 = vmatprep.subr.bf16.mxu1 %v6409_v42 }
  0xbc   :  { %5837 = vmatpush3.bf16.msra.mxu0 %v6410_v43 }
  0xbd   :  { %5838 = vmatprep.subr.bf16.mxu0 %v6412_v45 }
  0xbe   :  { %5859 = vmatpush3.bf16.msra.mxu1 %v6411_v44  ;;  %v6457_v44 = vld [vmem:[%s8190_s1 + $0x768] sm:$0xff]  }
  0xbf   :  { %5860 = vmatprep.subr.bf16.mxu1 %v6413_v46  ;;  %v6458_v46 = vld [vmem:[%s8190_s1 + $0x7e8] sm:$0xff]  }
  0xc0   :  { %5839 = vmatpush3.bf16.msra.mxu0 %v6414_v47 }
  0xc1   :  { %5868 = vmatprep.subr.bf16.mxu0 %v6417_v50 }
  0xc2   :  { %5861 = vmatpush3.bf16.msra.mxu1 %v6415_v48 }
  0xc3   :  { %4453 = vmatmul.mubr.bf16.vlgmr.msra.gmra.mxu0 %v1061_v49  ;;  %5890 = vmatprep.subr.bf16.mxu1 %v6418_v51  ;;  %v6459_v49 = vld [vmem:[%s8190_s1 + $0x728] sm:$0xff]  }
  0xc4   :  { %5869 = vmatpush3.bf16.msra.mxu0 %v6419_v52  ;;  %4532 = vmatprep.mubr.bf16.mxu0 %v1117_v23  ;;  %v6460_v52 = vld [vmem:[%s8190_s1 + $0x7a8] sm:$0xff]   ;;  %v6489_v23 = vld [vmem:[%s8190_s1 + $0x8b0] sm:$0xff]  }
  0xc5   :  { %4493 = vmatmul.mubr.bf16.vlgmr.msra.gmra.mxu1 %v1077_v54  ;;  %5870 = vmatprep.subr.bf16.mxu0 %v6421_v55  ;;  %v6461_v55 = vld [vmem:[%s8190_s1 + $0x760] sm:$0xff]  }
  0xc6   :  { %5891 = vmatpush3.bf16.msra.mxu1 %v6420_v53  ;;  %4572 = vmatprep.mubr.bf16.mxu1 %v1127_v26  ;;  %v6490_v26 = vld [vmem:[%s8190_s1 + $0x868] sm:$0xff]  }
  0xc7   :  { %5892 = vmatprep.subr.bf16.mxu1 %v6422_v56 }
  0xc8   :  { %5871 = vmatpush3.bf16.msra.mxu0 %v6423_v57  ;;  %v6462_v57 = vld [vmem:[%s8190_s1 + $0x7e0] sm:$0xff]  }
  0xc9   :  { %5872 = vmatprep.subr.bf16.mxu0 %v6425_v59  ;;  %v6463_v59 = vld [vmem:[%s8190_s1 + $0x720] sm:$0xff]  }
  0xca   :  { %5893 = vmatpush3.bf16.msra.mxu1 %v6424_v58 }
  0xcb   :  { %5894 = vmatprep.subr.bf16.mxu1 %v6426_v60  ;;  %v6464_v60 = vld [vmem:[%s8190_s1 + $0x7a0] sm:$0xff]  }
  0xcc   :  { %5873 = vmatpush3.bf16.msra.mxu0 %v6427_v61  ;;  %v6465_v61 = vld [vmem:[%s8190_s1 + $0x758] sm:$0xff]  }
  0xcd   :  { %5874 = vmatprep.subr.bf16.mxu0 %v6429_v63  ;;  %v6467_v63 = vld [vmem:[%s8190_s1 + $0x718] sm:$0xff]  }
  0xce   :  { %5895 = vmatpush3.bf16.msra.mxu1 %v6428_v62  ;;  %v6466_v62 = vld [vmem:[%s8190_s1 + $0x7d8] sm:$0xff]  }
  0xcf   :  { %5896 = vmatprep.subr.bf16.mxu1 %v6430_v0  ;;  %v6468_v0 = vld [vmem:[%s8190_s1 + $0x798] sm:$0xff]  }
  0xd0   :  { %5875 = vmatpush3.bf16.msra.mxu0 %v6431_v1  ;;  %v6469_v1 = vld [vmem:[%s8190_s1 + $0x750] sm:$0xff]  }
  0xd1   :  { %5876 = vmatprep.subr.bf16.mxu0 %v6433_v3  ;;  %v6471_v3 = vld [vmem:[%s8190_s1 + $0x710] sm:$0xff]  }
  0xd2   :  { %5897 = vmatpush3.bf16.msra.mxu1 %v6432_v2  ;;  %v6470_v2 = vld [vmem:[%s8190_s1 + $0x7d0] sm:$0xff]  }
  0xd3   :  { %5898 = vmatprep.subr.bf16.mxu1 %v6434_v4  ;;  %v6472_v4 = vld [vmem:[%s8190_s1 + $0x790] sm:$0xff]  }
  0xd4   :  { %5877 = vmatpush3.bf16.msra.mxu0 %v6435_v5  ;;  %v6473_v5 = vld [vmem:[%s8190_s1 + $0x748] sm:$0xff]  }
  0xd5   :  { %5878 = vmatprep.subr.bf16.mxu0 %v6437_v7  ;;  %v6475_v7 = vld [vmem:[%s8190_s1 + $0x708] sm:$0xff]  }
  0xd6   :  { %5899 = vmatpush3.bf16.msra.mxu1 %v6436_v6  ;;  %v6474_v6 = vld [vmem:[%s8190_s1 + $0x7c8] sm:$0xff]  }
  0xd7   :  { %5900 = vmatprep.subr.bf16.mxu1 %v6438_v8  ;;  %v6476_v8 = vld [vmem:[%s8190_s1 + $0x788] sm:$0xff]  }
  0xd8   :  { %5879 = vmatpush3.bf16.msra.mxu0 %v6439_v9  ;;  %v6477_v9 = vld [vmem:[%s8190_s1 + $0x740] sm:$0xff]  }
  0xd9   :  { %5880 = vmatprep.subr.bf16.mxu0 %v6441_v11  ;;  %v6479_v11 = vld [vmem:[%s8190_s1 + $0x700] sm:$0xff]  }
  0xda   :  { %5901 = vmatpush3.bf16.msra.mxu1 %v6440_v10  ;;  %v6478_v10 = vld [vmem:[%s8190_s1 + $0x7c0] sm:$0xff]  }
  0xdb   :  { %5902 = vmatprep.subr.bf16.mxu1 %v6442_v13  ;;  %v1110_v13 = vrot.slane %v7430_v19, %v6826_v41  ;;  %v6486_v19 = vld [vmem:[%s8190_s1 + $0x870] sm:$0xff]  }
  0xdc   :  { %5881 = vmatpush3.bf16.msra.mxu0 %v6443_v16  ;;  %v6484_v16 = vld [vmem:[%s8190_s1 + $0x838] sm:$0xff]  }
  0xdd   :  { %5882 = vmatprep.subr.bf16.mxu0 %v6445_v17  ;;  %v6485_v17 = vld [vmem:[%s8190_s1 + $0x8b8] sm:$0xff]   ;;  %v1126_v18 = vcombine.high %v1110_v13, %v1110_v13 }
  0xde   :  { %5903 = vmatpush3.bf16.msra.mxu1 %v6444_v20  ;;  %v6487_v20 = vld [vmem:[%s8190_s1 + $0x8f0] sm:$0xff]  }
  0xdf   :  { %5904 = vmatprep.subr.bf16.mxu1 %v6446_v21 }
  0xe0   :  { %5883 = vmatpush3.bf16.msra.mxu0 %v6447_v22  ;;  %v6488_v22 = vld [vmem:[%s8190_s1 + $0x830] sm:$0xff]  }
  0xe1   :  { %5912 = vmatprep.subr.bf16.mxu0 %v6449_v28  ;;  %v6491_v28 = vld [vmem:[%s8190_s1 + $0x8e8] sm:$0xff]  }
  0xe2   :  { %5905 = vmatpush3.bf16.msra.mxu1 %v6448_v25 }
  0xe3   :  { %v5620_v37 = vpop.f32.mrf.mxu0  ;;  %4533 = vmatmul.mubr.bf16.vlgmr.msra.gmra.mxu0 %v1103_v27  ;;  %5934 = vmatprep.subr.bf16.mxu1 %v6450_v29 }
  0xe4   :  { %5913 = vmatpush3.bf16.msra.mxu0 %v6451_v31  ;;  %4612 = vmatprep.mubr.bf16.mxu0 %v1124_v30  ;;  %v5642_v42 = vpop.f32.mrf.mxu1  ;;  %v6492_v31 = vld [vmem:[%s8190_s1 + $0x828] sm:$0xff]  }
  0xe5   :  { %4573 = vmatmul.mubr.bf16.vlgmr.msra.gmra.mxu1 %v1125_v33  ;;  %v5621_v43 = vpop.f32.mrf.mxu0  ;;  %5914 = vmatprep.subr.bf16.mxu0 %v6453_v34  ;;  %v6493_v34 = vld [vmem:[%s8190_s1 + $0x8a8] sm:$0xff]  }
  0xe6   :  { %5935 = vmatpush3.bf16.msra.mxu1 %v6452_v32  ;;  %v5622_v45 = vadd.f32 %v5621_v43, %v5620_v37  ;;  %4652 = vmatprep.mubr.bf16.mxu1 %v1128_v36  ;;  %v5643_v47 = vpop.f32.mrf.mxu1  ;;  %v6494_v37 = vld [vmem:[%s8190_s1 + $0x860] sm:$0xff]  }
  0xe7   :  { %v5623_v48 = vpop.f32.mrf.mxu0  ;;  %5936 = vmatprep.subr.bf16.mxu1 %v6454_v35  ;;  %v5644_v51 = vadd.f32 %v5643_v47, %v5642_v42  ;;  %v6496_v42 = vld [vmem:[%s8190_s1 + $0x820] sm:$0xff]   ;;  %v6501_v47 = vld [vmem:[%s8190_s1 + $0x898] sm:$0xff]  }
  0xe8   :  { %v4055_v50 = vadd.f32 %v5622_v45, %v5155_v38  ;;  %5915 = vmatpush3.bf16.msra.mxu0 %v6455_v39  ;;  %v5645_v53 = vpop.f32.mrf.mxu1  ;;  %v6495_v39 = vld [vmem:[%s8190_s1 + $0x8e0] sm:$0xff]   ;;  %v6499_v45 = vld [vmem:[%s8190_s1 + $0x8d8] sm:$0xff]   ;;  %v6502_v48 = vld [vmem:[%s8190_s1 + $0x850] sm:$0xff]  }
  0xe9   :  { %v5624_v54 = vpop.f32.mrf.mxu0  ;;  %5916 = vmatprep.subr.bf16.mxu0 %v6457_v44  ;;  %v6497_v43 = vld [vmem:[%s8190_s1 + $0x8a0] sm:$0xff]   ;;  %v6498_v44 = vld [vmem:[%s8190_s1 + $0x858] sm:$0xff]   ;;  %v6507_v53 = vld [vmem:[%s8190_s1 + $0x8c8] sm:$0xff]  }
  0xea   :  { %v7491_v56 = vadd.f32 %v5644_v51, %v4055_v50  ;;  %5937 = vmatpush3.bf16.msra.mxu1 %v6456_v40  ;;  %v5646_v58 = vpop.f32.mrf.mxu1  ;;  %v6504_v50 = vld [vmem:[%s8190_s1 + $0x810] sm:$0xff]   ;;  %v20_v54 = vld [vmem:[%s8189_s0 + $0x20] sm:$0xff] }
  0xeb   :  { %5938 = vmatprep.subr.bf16.mxu1 %v6458_v46  ;;  %v6500_v46 = vld [vmem:[%s8190_s1 + $0x818] sm:$0xff]   ;;  %v6505_v51 = vld [vmem:[%s8190_s1 + $0x890] sm:$0xff]   ;;  %v6509_v58 = vld [vmem:[%s8190_s1 + $0x888] sm:$0xff]  }
  0xec   :  { %5917 = vmatpush3.bf16.msra.mxu0 %v6459_v49  ;;  %v6503_v49 = vld [vmem:[%s8190_s1 + $0x8d0] sm:$0xff]  }
  0xed   :  { %5918 = vmatprep.subr.bf16.mxu0 %v6461_v55  ;;  %v6508_v55 = vld [vmem:[%s8190_s1 + $0x808] sm:$0xff]  }
  0xee   :  { %5939 = vmatpush3.bf16.msra.mxu1 %v6460_v52  ;;  %v6506_v52 = vld [vmem:[%s8190_s1 + $0x848] sm:$0xff]  }
  0xef   :  { %5940 = vmatprep.subr.bf16.mxu1 %v6462_v57  ;;  %v1129_v57 = vcombine.high %v20_v54, %v20_v54 }
  0xf0   :  { %5919 = vmatpush3.bf16.msra.mxu0 %v6463_v59  ;;  %v6510_v59 = vld [vmem:[%s8190_s1 + $0x840] sm:$0xff]  }
  0xf1   :  { %5920 = vmatprep.subr.bf16.mxu0 %v6465_v61  ;;  %v7647_v61 = vrot.slane %v1129_v57, %v6826_v41  ;;  %v6550_v57 = vld [vmem:[%s8190_s1 + $0xab8] sm:$0xff]  }
  0xf2   :  { %5941 = vmatpush3.bf16.msra.mxu1 %v6464_v60 }
  0xf3   :  { %5942 = vmatprep.subr.bf16.mxu1 %v6466_v62  ;;  %v6511_v62 = vld [vmem:[%s8190_s1 + $0x8c0] sm:$0xff]  }
  0xf4   :  { %5921 = vmatpush3.bf16.msra.mxu0 %v6467_v63  ;;  %v6512_v63 = vld [vmem:[%s8190_s1 + $0x800] sm:$0xff]  }
  0xf5   :  { %5922 = vmatprep.subr.bf16.mxu0 %v6469_v1  ;;  %v1145_v1 = vcombine.high %v7647_v61, %v7647_v61 }
  0xf6   :  { %5943 = vmatpush3.bf16.msra.mxu1 %v6468_v0 }
  0xf7   :  { %5944 = vmatprep.subr.bf16.mxu1 %v6470_v2  ;;  %v6513_v2 = vld [vmem:[%s8190_s1 + $0x880] sm:$0xff]  }
  0xf8   :  { %5923 = vmatpush3.bf16.msra.mxu0 %v6471_v3 }
  0xf9   :  { %5924 = vmatprep.subr.bf16.mxu0 %v6473_v5  ;;  %v6514_v5 = vld [vmem:[%s8190_s1 + $0x978] sm:$0xff]  }
  0xfa   :  { %5945 = vmatpush3.bf16.msra.mxu1 %v6472_v4 }
  0xfb   :  { %5946 = vmatprep.subr.bf16.mxu1 %v6474_v6  ;;  %v6515_v6 = vld [vmem:[%s8190_s1 + $0x9f8] sm:$0xff]  }
  0xfc   :  { %5925 = vmatpush3.bf16.msra.mxu0 %v6475_v7  ;;  %v1173_v7 = vrot.slane %v1145_v1, %v6826_v41 }
  0xfd   :  { %5926 = vmatprep.subr.bf16.mxu0 %v6477_v9  ;;  %v6517_v9 = vld [vmem:[%s8190_s1 + $0x9b8] sm:$0xff]  }
  0xfe   :  { %5947 = vmatpush3.bf16.msra.mxu1 %v6476_v8  ;;  %v6516_v8 = vld [vmem:[%s8190_s1 + $0x938] sm:$0xff]  }
  0xff   :  { %5948 = vmatprep.subr.bf16.mxu1 %v6478_v10 }
 0x100   :  { %5927 = vmatpush3.bf16.msra.mxu0 %v6479_v11  ;;  %v6518_v11 = vld [vmem:[%s8190_s1 + $0x970] sm:$0xff]  }
 0x101   :  { %5956 = vmatprep.subr.bf16.mxu0 %v6482_v14 }
 0x102   :  { %5949 = vmatpush3.bf16.msra.mxu1 %v6480_v12  ;;  %v6519_v12 = vld [vmem:[%s8190_s1 + $0x9f0] sm:$0xff]  }
 0x103   :  { %v5664_v21 = vpop.f32.mrf.mxu0  ;;  %4613 = vmatmul.mubr.bf16.vlgmr.msra.gmra.mxu0 %v1110_v13  ;;  %5978 = vmatprep.subr.bf16.mxu1 %v6483_v15  ;;  %v1177_v13 = vcombine.high %v1173_v7, %v1173_v7  ;;  %v6520_v15 = vld [vmem:[%s8190_s1 + $0x930] sm:$0xff]  }
 0x104   :  { %5957 = vmatpush3.bf16.msra.mxu0 %v6484_v16  ;;  %v5686_v24 = vpop.f32.mrf.mxu1  ;;  %v6521_v16 = vld [vmem:[%s8190_s1 + $0x9b0] sm:$0xff]  }
 0x105   :  { %4653 = vmatmul.mubr.bf16.vlgmr.msra.gmra.mxu1 %v1126_v18  ;;  %v5665_v25 = vpop.f32.mrf.mxu0  ;;  %5958 = vmatprep.subr.bf16.mxu0 %v6486_v19  ;;  %v6522_v19 = vld [vmem:[%s8190_s1 + $0x968] sm:$0xff]  }
 0x106   :  { %5979 = vmatpush3.bf16.msra.mxu1 %v6485_v17  ;;  %v5666_v27 = vadd.f32 %v5665_v25, %v5664_v21  ;;  %v5687_v29 = vpop.f32.mrf.mxu1  ;;  %v6523_v21 = vld [vmem:[%s8190_s1 + $0x9e8] sm:$0xff]  }
 0x107   :  { %v5667_v30 = vpop.f32.mrf.mxu0  ;;  %5980 = vmatprep.subr.bf16.mxu1 %v6487_v20  ;;  %v5688_v33 = vadd.f32 %v5687_v29, %v5686_v24  ;;  %v6524_v24 = vld [vmem:[%s8190_s1 + $0x928] sm:$0xff]  }
 0x108   :  { %v4135_v32 = vadd.f32 %v5666_v27, %v7491_v56  ;;  %5959 = vmatpush3.bf16.msra.mxu0 %v6488_v22  ;;  %v5689_v35 = vpop.f32.mrf.mxu1  ;;  %v1136_v56 = vrot.slane %v20_v54, %v6826_v41  ;;  %v6525_v27 = vld [vmem:[%s8190_s1 + $0x9a8] sm:$0xff]   ;;  %v6526_v30 = vld [vmem:[%s8190_s1 + $0x960] sm:$0xff]   ;;  %v6547_v54 = vld [vmem:[%s8190_s1 + $0xa78] sm:$0xff]  }
 0x109   :  { %v5668_v36 = vpop.f32.mrf.mxu0  ;;  %5960 = vmatprep.subr.bf16.mxu0 %v6490_v26  ;;  %v6529_v35 = vld [vmem:[%s8190_s1 + $0x9a0] sm:$0xff]  }
 0x10a   :  { %v7592_v38 = vadd.f32 %v5688_v33, %v4135_v32  ;;  %5981 = vmatpush3.bf16.msra.mxu1 %v6489_v23  ;;  %v5690_v40 = vpop.f32.mrf.mxu1  ;;  %v1144_v60 = vcombine.high %v1136_v56, %v1136_v56  ;;  %v1152_v4 = vrot.slane %v1136_v56, %v6826_v41  ;;  %v6527_v32 = vld [vmem:[%s8190_s1 + $0x9e0] sm:$0xff]   ;;  %v6530_v36 = vld [vmem:[%s8190_s1 + $0x958] sm:$0xff]  }
 0x10b   :  { %5982 = vmatprep.subr.bf16.mxu1 %v6491_v28  ;;  %v6534_v40 = vld [vmem:[%s8190_s1 + $0x950] sm:$0xff]   ;;  %v6549_v56 = vld [vmem:[%s8190_s1 + $0xa38] sm:$0xff]  }
 0x10c   :  { %5961 = vmatpush3.bf16.msra.mxu0 %v6492_v31  ;;  %v1166_v0 = vrot.slane %v1144_v60, %v6826_v41  ;;  %v1174_v10 = vcombine.high %v1152_v4, %v1152_v4  ;;  %v6552_v60 = vld [vmem:[%s8190_s1 + $0xaf0] sm:$0xff]  }
 0x10d   :  { %5962 = vmatprep.subr.bf16.mxu0 %v6494_v37  ;;  %v6531_v37 = vld [vmem:[%s8190_s1 + $0x9d8] sm:$0xff]  }
 0x10e   :  { %5983 = vmatpush3.bf16.msra.mxu1 %v6493_v34  ;;  %4692 = vmatprep.mubr.bf16.mxu0 %v1166_v0  ;;  %v1176_v3 = vcombine.high %v1166_v0, %v1166_v0  ;;  %v6528_v34 = vld [vmem:[%s8190_s1 + $0x920] sm:$0xff]  }
 0x10f   :  { %5984 = vmatprep.subr.bf16.mxu1 %v6495_v39  ;;  %v6533_v39 = vld [vmem:[%s8190_s1 + $0x998] sm:$0xff]  }
 0x110   :  { %5963 = vmatpush3.bf16.msra.mxu0 %v6496_v42  ;;  %4732 = vmatprep.mubr.bf16.mxu1 %v1176_v3  ;;  %v6535_v42 = vld [vmem:[%s8190_s1 + $0x9d0] sm:$0xff]  }
 0x111   :  { %5964 = vmatprep.subr.bf16.mxu0 %v6498_v44  ;;  %v6537_v44 = vld [vmem:[%s8190_s1 + $0x990] sm:$0xff]  }
 0x112   :  { %5985 = vmatpush3.bf16.msra.mxu1 %v6497_v43  ;;  %v6536_v43 = vld [vmem:[%s8190_s1 + $0x910] sm:$0xff]  }
 0x113   :  { %5986 = vmatprep.subr.bf16.mxu1 %v6499_v45  ;;  %v6538_v45 = vld [vmem:[%s8190_s1 + $0x948] sm:$0xff]  }
 0x114   :  { %5965 = vmatpush3.bf16.msra.mxu0 %v6500_v46  ;;  %v6539_v46 = vld [vmem:[%s8190_s1 + $0x9c8] sm:$0xff]  }
 0x115   :  { %5966 = vmatprep.subr.bf16.mxu0 %v6502_v48  ;;  %v6541_v48 = vld [vmem:[%s8190_s1 + $0x988] sm:$0xff]  }
 0x116   :  { %5987 = vmatpush3.bf16.msra.mxu1 %v6501_v47  ;;  %v6540_v47 = vld [vmem:[%s8190_s1 + $0x908] sm:$0xff]  }
 0x117   :  { %5988 = vmatprep.subr.bf16.mxu1 %v6503_v49  ;;  %v6542_v49 = vld [vmem:[%s8190_s1 + $0x940] sm:$0xff]  }
 0x118   :  { %5967 = vmatpush3.bf16.msra.mxu0 %v6504_v50  ;;  %v6543_v50 = vld [vmem:[%s8190_s1 + $0x9c0] sm:$0xff]  }
 0x119   :  { %5968 = vmatprep.subr.bf16.mxu0 %v6506_v52  ;;  %v6545_v52 = vld [vmem:[%s8190_s1 + $0x980] sm:$0xff]  }
 0x11a   :  { %5989 = vmatpush3.bf16.msra.mxu1 %v6505_v51  ;;  %v6544_v51 = vld [vmem:[%s8190_s1 + $0x900] sm:$0xff]  }
 0x11b   :  { %5990 = vmatprep.subr.bf16.mxu1 %v6507_v53  ;;  %v1159_v53 = vrot.slane %v7647_v61, %v6826_v41 }
 0x11c   :  { %5969 = vmatpush3.bf16.msra.mxu0 %v6508_v55  ;;  %v6548_v55 = vld [vmem:[%s8190_s1 + $0xaf8] sm:$0xff]  }
 0x11d   :  { %5970 = vmatprep.subr.bf16.mxu0 %v6510_v59  ;;  %v6551_v59 = vld [vmem:[%s8190_s1 + $0xa70] sm:$0xff]  }
 0x11e   :  { %5991 = vmatpush3.bf16.msra.mxu1 %v6509_v58  ;;  %v1175_v58 = vcombine.high %v1159_v53, %v1159_v53 }
 0x11f   :  { %5992 = vmatprep.subr.bf16.mxu1 %v6511_v62  ;;  %v6553_v62 = vld [vmem:[%s8190_s1 + $0xa30] sm:$0xff]  }
 0x120   :  { %5971 = vmatpush3.bf16.msra.mxu0 %v6512_v63  ;;  %v6554_v63 = vld [vmem:[%s8190_s1 + $0xab0] sm:$0xff]  }
 0x121   :  { %6000 = vmatprep.subr.bf16.mxu0 %v6514_v5 }
 0x122   :  { %5993 = vmatpush3.bf16.msra.mxu1 %v6513_v2  ;;  %v6555_v2 = vld [vmem:[%s8190_s1 + $0xa68] sm:$0xff]  }
 0x123   :  { %v5708_v14 = vpop.f32.mrf.mxu0  ;;  %4693 = vmatmul.mubr.bf16.vlgmr.msra.gmra.mxu0 %v1152_v4  ;;  %6022 = vmatprep.subr.bf16.mxu1 %v6515_v6  ;;  %v6556_v4 = vld [vmem:[%s8190_s1 + $0xae8] sm:$0xff]  }
 0x124   :  { %6001 = vmatpush3.bf16.msra.mxu0 %v6516_v8  ;;  %4772 = vmatprep.mubr.bf16.mxu0 %v1173_v7  ;;  %v6557_v7 = vld [vmem:[%s8190_s1 + $0xa28] sm:$0xff]  }
 0x125   :  { %v5730_v17 = vpop.f32.mrf.mxu1  ;;  %4733 = vmatmul.mubr.bf16.vlgmr.msra.gmra.mxu1 %v1174_v10  ;;  %v5709_v18 = vpop.f32.mrf.mxu0  ;;  %6002 = vmatprep.subr.bf16.mxu0 %v6518_v11  ;;  %v6558_v10 = vld [vmem:[%s8190_s1 + $0xaa8] sm:$0xff]  }
 0x126   :  { %6023 = vmatpush3.bf16.msra.mxu1 %v6517_v9  ;;  %v5710_v20 = vadd.f32 %v5709_v18, %v5708_v14  ;;  %4812 = vmatprep.mubr.bf16.mxu1 %v1177_v13  ;;  %v6559_v13 = vld [vmem:[%s8190_s1 + $0xa60] sm:$0xff]  }
 0x127   :  { %v5731_v22 = vpop.f32.mrf.mxu1  ;;  %v5711_v23 = vpop.f32.mrf.mxu0  ;;  %6024 = vmatprep.subr.bf16.mxu1 %v6519_v12  ;;  %v6562_v18 = vld [vmem:[%s8190_s1 + $0xaa0] sm:$0xff]  }
 0x128   :  { %v4215_v25 = vadd.f32 %v5710_v20, %v7592_v38  ;;  %v5732_v26 = vadd.f32 %v5731_v22, %v5730_v17  ;;  %6003 = vmatpush3.bf16.msra.mxu0 %v6520_v15  ;;  %v6532_v38 = vld [vmem:[%s8190_s1 + $0x918] sm:$0xff]   ;;  %v6560_v15 = vld [vmem:[%s8190_s1 + $0xae0] sm:$0xff]   ;;  %v6567_v23 = vld [vmem:[%s8190_s1 + $0xa50] sm:$0xff]  }
 0x129   :  { %v5733_v28 = vpop.f32.mrf.mxu1  ;;  %v5712_v29 = vpop.f32.mrf.mxu0  ;;  %6004 = vmatprep.subr.bf16.mxu0 %v6522_v19  ;;  %v6561_v17 = vld [vmem:[%s8190_s1 + $0xa20] sm:$0xff]   ;;  %v6563_v19 = vld [vmem:[%s8190_s1 + $0xa58] sm:$0xff]  }
 0x12a   :  { %v7703_v31 = vadd.f32 %v5732_v26, %v4215_v25  ;;  %6025 = vmatpush3.bf16.msra.mxu1 %v6521_v16  ;;  %v6564_v20 = vld [vmem:[%s8190_s1 + $0xad8] sm:$0xff]   ;;  %v6569_v25 = vld [vmem:[%s8190_s1 + $0xa10] sm:$0xff]   ;;  %v6572_v28 = vld [vmem:[%s8190_s1 + $0xac8] sm:$0xff]  }
 0x12b   :  { %v5734_v33 = vpop.f32.mrf.mxu1  ;;  %6026 = vmatprep.subr.bf16.mxu1 %v6523_v21  ;;  %v6565_v21 = vld [vmem:[%s8190_s1 + $0xa18] sm:$0xff]   ;;  %v6570_v26 = vld [vmem:[%s8190_s1 + $0xa90] sm:$0xff]   ;;  %v21_v29 = vld [vmem:[%s8189_s0 + $0x28] sm:$0xff] }
 0x12c   :  { %6005 = vmatpush3.bf16.msra.mxu0 %v6524_v24  ;;  %v6566_v22 = vld [vmem:[%s8190_s1 + $0xa98] sm:$0xff]   ;;  %v6568_v24 = vld [vmem:[%s8190_s1 + $0xad0] sm:$0xff]   ;;  %v6575_v33 = vld [vmem:[%s8190_s1 + $0xa40] sm:$0xff]  }
 0x12d   :  { %6006 = vmatprep.subr.bf16.mxu0 %v6526_v30  ;;  %v6573_v30 = vld [vmem:[%s8190_s1 + $0xa08] sm:$0xff]  }
 0x12e   :  { %6027 = vmatpush3.bf16.msra.mxu1 %v6525_v27  ;;  %v6571_v27 = vld [vmem:[%s8190_s1 + $0xa48] sm:$0xff]  }
 0x12f   :  { %6028 = vmatprep.subr.bf16.mxu1 %v6527_v32  ;;  %v1178_v32 = vcombine.high %v21_v29, %v21_v29 }
 0x130   :  { %6007 = vmatpush3.bf16.msra.mxu0 %v6528_v34  ;;  %v6574_v34 = vld [vmem:[%s8190_s1 + $0xa88] sm:$0xff]  }
 0x131   :  { %6008 = vmatprep.subr.bf16.mxu0 %v6530_v36  ;;  %v7859_v36 = vrot.slane %v1178_v32, %v6826_v41 }
 0x132   :  { %6029 = vmatpush3.bf16.msra.mxu1 %v6529_v35 }
 0x133   :  { %6030 = vmatprep.subr.bf16.mxu1 %v6531_v37  ;;  %v6576_v37 = vld [vmem:[%s8190_s1 + $0xac0] sm:$0xff]  }
 0x134   :  { %6009 = vmatpush3.bf16.msra.mxu0 %v6532_v38  ;;  %v6577_v38 = vld [vmem:[%s8190_s1 + $0xa00] sm:$0xff]  }
 0x135   :  { %6010 = vmatprep.subr.bf16.mxu0 %v6534_v40  ;;  %v1194_v40 = vcombine.high %v7859_v36, %v7859_v36 }
 0x136   :  { %6031 = vmatpush3.bf16.msra.mxu1 %v6533_v39 }
 0x137   :  { %6032 = vmatprep.subr.bf16.mxu1 %v6535_v42 }
 0x138   :  { %6011 = vmatpush3.bf16.msra.mxu0 %v6536_v43  ;;  %v6579_v43 = vld [vmem:[%s8190_s1 + $0xb78] sm:$0xff]  }
 0x139   :  { %6012 = vmatprep.subr.bf16.mxu0 %v6538_v45 }
 0x13a   :  { %6033 = vmatpush3.bf16.msra.mxu1 %v6537_v44  ;;  %v6578_v44 = vld [vmem:[%s8190_s1 + $0xa80] sm:$0xff]  }
 0x13b   :  { %6034 = vmatprep.subr.bf16.mxu1 %v6539_v46  ;;  %v1222_v46 = vrot.slane %v1194_v40, %v6826_v41  ;;  %v6620_v40 = vld [vmem:[%s8190_s1 + $0xc68] sm:$0xff]  }
 0x13c   :  { %6013 = vmatpush3.bf16.msra.mxu0 %v6540_v47  ;;  %v6580_v47 = vld [vmem:[%s8190_s1 + $0xbf8] sm:$0xff]  }
 0x13d   :  { %6014 = vmatprep.subr.bf16.mxu0 %v6542_v49 }
 0x13e   :  { %6035 = vmatpush3.bf16.msra.mxu1 %v6541_v48  ;;  %v6581_v48 = vld [vmem:[%s8190_s1 + $0xb38] sm:$0xff]  }
 0x13f   :  { %6036 = vmatprep.subr.bf16.mxu1 %v6543_v50  ;;  %v6583_v50 = vld [vmem:[%s8190_s1 + $0xb70] sm:$0xff]  }
 0x140   :  { %6015 = vmatpush3.bf16.msra.mxu0 %v6544_v51  ;;  %v6582_v51 = vld [vmem:[%s8190_s1 + $0xbb8] sm:$0xff]  }
 0x141   :  { %6044 = vmatprep.subr.bf16.mxu0 %v6547_v54  ;;  %v6584_v54 = vld [vmem:[%s8190_s1 + $0xbf0] sm:$0xff]  }
 0x142   :  { %6037 = vmatpush3.bf16.msra.mxu1 %v6545_v52  ;;  %v1226_v52 = vcombine.high %v1222_v46, %v1222_v46 }
 0x143   :  { %v5752_v61 = vpop.f32.mrf.mxu0  ;;  %4773 = vmatmul.mubr.bf16.vlgmr.msra.gmra.mxu0 %v1159_v53  ;;  %6066 = vmatprep.subr.bf16.mxu1 %v6548_v55  ;;  %v6585_v55 = vld [vmem:[%s8190_s1 + $0xb30] sm:$0xff]  }
 0x144   :  { %6045 = vmatpush3.bf16.msra.mxu0 %v6549_v56 }
 0x145   :  { %v5774_v0 = vpop.f32.mrf.mxu1  ;;  %4813 = vmatmul.mubr.bf16.vlgmr.msra.gmra.mxu1 %v1175_v58  ;;  %v5753_v1 = vpop.f32.mrf.mxu0  ;;  %6046 = vmatprep.subr.bf16.mxu0 %v6551_v59  ;;  %v6587_v58 = vld [vmem:[%s8190_s1 + $0xb68] sm:$0xff]  }
 0x146   :  { %6067 = vmatpush3.bf16.msra.mxu1 %v6550_v57  ;;  %v5754_v3 = vadd.f32 %v5753_v1, %v5752_v61 }
 0x147   :  { %v5775_v5 = vpop.f32.mrf.mxu1  ;;  %v5755_v6 = vpop.f32.mrf.mxu0  ;;  %6068 = vmatprep.subr.bf16.mxu1 %v6552_v60  ;;  %v6586_v60 = vld [vmem:[%s8190_s1 + $0xbb0] sm:$0xff]  }
 0x148   :  { %v4295_v8 = vadd.f32 %v5754_v3, %v7703_v31  ;;  %v5776_v9 = vadd.f32 %v5775_v5, %v5774_v0  ;;  %6047 = vmatpush3.bf16.msra.mxu0 %v6553_v62  ;;  %v1185_v31 = vrot.slane %v21_v29, %v6826_v41  ;;  %v6591_v5 = vld [vmem:[%s8190_s1 + $0xb60] sm:$0xff]  }
 0x149   :  { %v5777_v11 = vpop.f32.mrf.mxu1  ;;  %v5756_v12 = vpop.f32.mrf.mxu0  ;;  %6048 = vmatprep.subr.bf16.mxu0 %v6555_v2  ;;  %v6589_v2 = vld [vmem:[%s8190_s1 + $0xb28] sm:$0xff]   ;;  %v6610_v29 = vld [vmem:[%s8190_s1 + $0xb80] sm:$0xff]  }
 0x14a   :  { %v7804_v14 = vadd.f32 %v5776_v9, %v4295_v8  ;;  %6069 = vmatpush3.bf16.msra.mxu1 %v6554_v63  ;;  %v1193_v35 = vcombine.high %v1185_v31, %v1185_v31  ;;  %v1201_v42 = vrot.slane %v1185_v31, %v6826_v41  ;;  %v6588_v63 = vld [vmem:[%s8190_s1 + $0xbe8] sm:$0xff]   ;;  %v6592_v9 = vld [vmem:[%s8190_s1 + $0xbe0] sm:$0xff]   ;;  %v6595_v11 = vld [vmem:[%s8190_s1 + $0xb58] sm:$0xff]  }
 0x14b   :  { %v5778_v16 = vpop.f32.mrf.mxu1  ;;  %6070 = vmatprep.subr.bf16.mxu1 %v6556_v4  ;;  %v6594_v12 = vld [vmem:[%s8190_s1 + $0xba0] sm:$0xff]   ;;  %v6614_v31 = vld [vmem:[%s8190_s1 + $0xc38] sm:$0xff]  }
 0x14c   :  { %6049 = vmatpush3.bf16.msra.mxu0 %v6557_v7  ;;  %v1215_v39 = vrot.slane %v1193_v35, %v6826_v41  ;;  %v1223_v49 = vcombine.high %v1201_v42, %v1201_v42  ;;  %v6590_v7 = vld [vmem:[%s8190_s1 + $0xba8] sm:$0xff]   ;;  %v6598_v16 = vld [vmem:[%s8190_s1 + $0xb98] sm:$0xff]  }
 0x14d   :  { %6050 = vmatprep.subr.bf16.mxu0 %v6559_v13  ;;  %v6596_v13 = vld [vmem:[%s8190_s1 + $0xbd8] sm:$0xff]  }
 0x14e   :  { %6071 = vmatpush3.bf16.msra.mxu1 %v6558_v10  ;;  %4852 = vmatprep.mubr.bf16.mxu0 %v1215_v39  ;;  %v1225_v45 = vcombine.high %v1215_v39, %v1215_v39  ;;  %v6593_v10 = vld [vmem:[%s8190_s1 + $0xb20] sm:$0xff]  }
 0x14f   :  { %6072 = vmatprep.subr.bf16.mxu1 %v6560_v15  ;;  %v6599_v15 = vld [vmem:[%s8190_s1 + $0xb50] sm:$0xff]  }
 0x150   :  { %6051 = vmatpush3.bf16.msra.mxu0 %v6561_v17  ;;  %4892 = vmatprep.mubr.bf16.mxu1 %v1225_v45  ;;  %v6600_v17 = vld [vmem:[%s8190_s1 + $0xbd0] sm:$0xff]  }
 0x151   :  { %6052 = vmatprep.subr.bf16.mxu0 %v6563_v19  ;;  %v6603_v19 = vld [vmem:[%s8190_s1 + $0xb48] sm:$0xff]  }
 0x152   :  { %6073 = vmatpush3.bf16.msra.mxu1 %v6562_v18  ;;  %v6601_v18 = vld [vmem:[%s8190_s1 + $0xb10] sm:$0xff]  }
 0x153   :  { %6074 = vmatprep.subr.bf16.mxu1 %v6564_v20  ;;  %v6602_v20 = vld [vmem:[%s8190_s1 + $0xb90] sm:$0xff]  }
 0x154   :  { %6053 = vmatpush3.bf16.msra.mxu0 %v6565_v21  ;;  %v6604_v21 = vld [vmem:[%s8190_s1 + $0xbc8] sm:$0xff]  }
 0x155   :  { %6054 = vmatprep.subr.bf16.mxu0 %v6567_v23  ;;  %v6607_v23 = vld [vmem:[%s8190_s1 + $0xb40] sm:$0xff]  }
 0x156   :  { %6075 = vmatpush3.bf16.msra.mxu1 %v6566_v22  ;;  %v6605_v22 = vld [vmem:[%s8190_s1 + $0xb08] sm:$0xff]  }
 0x157   :  { %6076 = vmatprep.subr.bf16.mxu1 %v6568_v24  ;;  %v6606_v24 = vld [vmem:[%s8190_s1 + $0xb88] sm:$0xff]  }
 0x158   :  { %6055 = vmatpush3.bf16.msra.mxu0 %v6569_v25  ;;  %v6608_v25 = vld [vmem:[%s8190_s1 + $0xbc0] sm:$0xff]  }
 0x159   :  { %6056 = vmatprep.subr.bf16.mxu0 %v6571_v27  ;;  %v1208_v27 = vrot.slane %v7859_v36, %v6826_v41  ;;  %v6617_v36 = vld [vmem:[%s8190_s1 + $0xcf0] sm:$0xff]  }
 0x15a   :  { %6077 = vmatpush3.bf16.msra.mxu1 %v6570_v26  ;;  %v6609_v26 = vld [vmem:[%s8190_s1 + $0xb00] sm:$0xff]  }
 0x15b   :  { %6078 = vmatprep.subr.bf16.mxu1 %v6572_v28  ;;  %v6612_v28 = vld [vmem:[%s8190_s1 + $0xc78] sm:$0xff]   ;;  %v1224_v32 = vcombine.high %v1208_v27, %v1208_v27 }
 0x15c   :  { %6057 = vmatpush3.bf16.msra.mxu0 %v6573_v30  ;;  %v6613_v30 = vld [vmem:[%s8190_s1 + $0xcf8] sm:$0xff]  }
 0x15d   :  { %6058 = vmatprep.subr.bf16.mxu0 %v6575_v33  ;;  %v6616_v33 = vld [vmem:[%s8190_s1 + $0xc70] sm:$0xff]  }
 0x15e   :  { %6079 = vmatpush3.bf16.msra.mxu1 %v6574_v34  ;;  %v6615_v34 = vld [vmem:[%s8190_s1 + $0xcb8] sm:$0xff]  }
 0x15f   :  { %6080 = vmatprep.subr.bf16.mxu1 %v6576_v37  ;;  %v6618_v37 = vld [vmem:[%s8190_s1 + $0xc30] sm:$0xff]  }
 0x160   :  { %6059 = vmatpush3.bf16.msra.mxu0 %v6577_v38 }
 0x161   :  { %6088 = vmatprep.subr.bf16.mxu0 %v6579_v43  ;;  %v6619_v43 = vld [vmem:[%s8190_s1 + $0xcb0] sm:$0xff]  }
 0x162   :  { %6081 = vmatpush3.bf16.msra.mxu1 %v6578_v44 }
 0x163   :  { %v5796_v53 = vpop.f32.mrf.mxu0  ;;  %4853 = vmatmul.mubr.bf16.vlgmr.msra.gmra.mxu0 %v1201_v42  ;;  %6110 = vmatprep.subr.bf16.mxu1 %v6580_v47 }
 0x164   :  { %6089 = vmatpush3.bf16.msra.mxu0 %v6581_v48  ;;  %4932 = vmatprep.mubr.bf16.mxu0 %v1222_v46  ;;  %v6621_v46 = vld [vmem:[%s8190_s1 + $0xce8] sm:$0xff]  }
 0x165   :  { %v5818_v56 = vpop.f32.mrf.mxu1  ;;  %4893 = vmatmul.mubr.bf16.vlgmr.msra.gmra.mxu1 %v1223_v49  ;;  %v5797_v57 = vpop.f32.mrf.mxu0  ;;  %6090 = vmatprep.subr.bf16.mxu0 %v6583_v50  ;;  %v6622_v49 = vld [vmem:[%s8190_s1 + $0xc28] sm:$0xff]  }
 0x166   :  { %6111 = vmatpush3.bf16.msra.mxu1 %v6582_v51  ;;  %v5798_v59 = vadd.f32 %v5797_v57, %v5796_v53  ;;  %4972 = vmatprep.mubr.bf16.mxu1 %v1226_v52  ;;  %v6624_v52 = vld [vmem:[%s8190_s1 + $0xc60] sm:$0xff]  }
 0x167   :  { %v5819_v61 = vpop.f32.mrf.mxu1  ;;  %v5799_v62 = vpop.f32.mrf.mxu0  ;;  %6112 = vmatprep.subr.bf16.mxu1 %v6584_v54  ;;  %v6623_v54 = vld [vmem:[%s8190_s1 + $0xca8] sm:$0xff]   ;;  %v6626_v57 = vld [vmem:[%s8190_s1 + $0xc20] sm:$0xff]  }
 0x168   :  { %v4375_v0 = vadd.f32 %v5798_v59, %v7804_v14  ;;  %v5820_v1 = vadd.f32 %v5819_v61, %v5818_v56  ;;  %6091 = vmatpush3.bf16.msra.mxu0 %v6585_v55  ;;  %v6597_v14 = vld [vmem:[%s8190_s1 + $0xb18] sm:$0xff]   ;;  %v6625_v56 = vld [vmem:[%s8190_s1 + $0xce0] sm:$0xff]   ;;  %v6632_v62 = vld [vmem:[%s8190_s1 + $0xc50] sm:$0xff]  }
 0x169   :  { %v5821_v3 = vpop.f32.mrf.mxu1  ;;  %v5800_v4 = vpop.f32.mrf.mxu0  ;;  %6092 = vmatprep.subr.bf16.mxu0 %v6587_v58  ;;  %v6628_v58 = vld [vmem:[%s8190_s1 + $0xc58] sm:$0xff]   ;;  %v6627_v59 = vld [vmem:[%s8190_s1 + $0xca0] sm:$0xff]  }
 0x16a   :  { %v7912_v6 = vadd.f32 %v5820_v1, %v4375_v0  ;;  %6113 = vmatpush3.bf16.msra.mxu1 %v6586_v60  ;;  %v6629_v60 = vld [vmem:[%s8190_s1 + $0xcd8] sm:$0xff]   ;;  %v6633_v0 = vld [vmem:[%s8190_s1 + $0xcd0] sm:$0xff]   ;;  %v6637_v4 = vld [vmem:[%s8190_s1 + $0xcc8] sm:$0xff]  }
 0x16b   :  { %v5822_v8 = vpop.f32.mrf.mxu1  ;;  %6114 = vmatprep.subr.bf16.mxu1 %v6588_v63  ;;  %v6630_v61 = vld [vmem:[%s8190_s1 + $0xc18] sm:$0xff]   ;;  %v6634_v1 = vld [vmem:[%s8190_s1 + $0xc10] sm:$0xff]  }
 0x16c   :  { %6093 = vmatpush3.bf16.msra.mxu0 %v6589_v2  ;;  %v6631_v63 = vld [vmem:[%s8190_s1 + $0xc98] sm:$0xff]   ;;  %v6636_v2 = vld [vmem:[%s8190_s1 + $0xc48] sm:$0xff]   ;;  %v6635_v3 = vld [vmem:[%s8190_s1 + $0xc90] sm:$0xff]  }
 0x16d   :  { %6094 = vmatprep.subr.bf16.mxu0 %v6591_v5  ;;  %v22_v5 = vld [vmem:[%s8189_s0 + $0x30] sm:$0xff] }
 0x16e   :  { %6115 = vmatpush3.bf16.msra.mxu1 %v6590_v7  ;;  %v1234_v7 = vrot.slane %v22_v5, %v6826_v41  ;;  %v1227_v8 = vcombine.high %v22_v5, %v22_v5 }
 0x16f   :  { %6116 = vmatprep.subr.bf16.mxu1 %v6592_v9  ;;  %v6640_v9 = vld [vmem:[%s8190_s1 + $0xc40] sm:$0xff]  }
 0x170   :  { %6095 = vmatpush3.bf16.msra.mxu0 %v6593_v10  ;;  %v6639_v10 = vld [vmem:[%s8190_s1 + $0xc88] sm:$0xff]  }
 0x171   :  { %6096 = vmatprep.subr.bf16.mxu0 %v6595_v11  ;;  %v1242_v11 = vcombine.high %v1234_v7, %v1234_v7 }
 0x172   :  { %6117 = vmatpush3.bf16.msra.mxu1 %v6594_v12  ;;  %v8071_v12 = vrot.slane %v1227_v8, %v6826_v41 }
 0x173   :  { %6118 = vmatprep.subr.bf16.mxu1 %v6596_v13  ;;  %v6641_v13 = vld [vmem:[%s8190_s1 + $0xcc0] sm:$0xff]  }
 0x174   :  { %6097 = vmatpush3.bf16.msra.mxu0 %v6597_v14  ;;  %v6642_v14 = vld [vmem:[%s8190_s1 + $0xc00] sm:$0xff]  }
 0x175   :  { %6098 = vmatprep.subr.bf16.mxu0 %v6599_v15  ;;  %v1264_v15 = vrot.slane %v1242_v11, %v6826_v41 }
 0x176   :  { %6119 = vmatpush3.bf16.msra.mxu1 %v6598_v16  ;;  %v1243_v16 = vcombine.high %v8071_v12, %v8071_v12 }
 0x177   :  { %6120 = vmatprep.subr.bf16.mxu1 %v6600_v17  ;;  %v1250_v17 = vrot.slane %v1234_v7, %v6826_v41 }
 0x178   :  { %6099 = vmatpush3.bf16.msra.mxu0 %v6601_v18  ;;  %v6644_v18 = vld [vmem:[%s8190_s1 + $0xd78] sm:$0xff]  }
 0x179   :  { %6100 = vmatprep.subr.bf16.mxu0 %v6603_v19  ;;  %v6643_v19 = vld [vmem:[%s8190_s1 + $0xc80] sm:$0xff]  }
 0x17a   :  { %6121 = vmatpush3.bf16.msra.mxu1 %v6602_v20  ;;  %v1274_v20 = vcombine.high %v1264_v15, %v1264_v15 }
 0x17b   :  { %6122 = vmatprep.subr.bf16.mxu1 %v6604_v21  ;;  %v1271_v21 = vrot.slane %v1243_v16, %v6826_v41 }
 0x17c   :  { %6101 = vmatpush3.bf16.msra.mxu0 %v6605_v22  ;;  %v6645_v22 = vld [vmem:[%s8190_s1 + $0xdf8] sm:$0xff]  }
 0x17d   :  { %6102 = vmatprep.subr.bf16.mxu0 %v6607_v23  ;;  %v6646_v23 = vld [vmem:[%s8190_s1 + $0xd38] sm:$0xff]  }
 0x17e   :  { %6123 = vmatpush3.bf16.msra.mxu1 %v6606_v24  ;;  %v1272_v24 = vcombine.high %v1250_v17, %v1250_v17 }
 0x17f   :  { %6124 = vmatprep.subr.bf16.mxu1 %v6608_v25  ;;  %v6648_v25 = vld [vmem:[%s8190_s1 + $0xd70] sm:$0xff]  }
 0x180   :  { %6103 = vmatpush3.bf16.msra.mxu0 %v6609_v26  ;;  %v6647_v26 = vld [vmem:[%s8190_s1 + $0xdb8] sm:$0xff]  }
 0x181   :  { %6132 = vmatprep.subr.bf16.mxu0 %v6612_v28 }
 0x182   :  { %6125 = vmatpush3.bf16.msra.mxu1 %v6610_v29  ;;  %v6649_v29 = vld [vmem:[%s8190_s1 + $0xdf0] sm:$0xff]  }
 0x183   :  { %v5840_v35 = vpop.f32.mrf.mxu0  ;;  %4933 = vmatmul.mubr.bf16.vlgmr.msra.gmra.mxu0 %v1208_v27  ;;  %6154 = vmatprep.subr.bf16.mxu1 %v6613_v30  ;;  %v1275_v27 = vcombine.high %v1271_v21, %v1271_v21  ;;  %v6650_v30 = vld [vmem:[%s8190_s1 + $0xd30] sm:$0xff]  }
 0x184   :  { %6133 = vmatpush3.bf16.msra.mxu0 %v6614_v31  ;;  %5012 = vmatprep.mubr.bf16.mxu0 %v1264_v15 }
 0x185   :  { %v5862_v38 = vpop.f32.mrf.mxu1  ;;  %4973 = vmatmul.mubr.bf16.vlgmr.msra.gmra.mxu1 %v1224_v32  ;;  %v5841_v39 = vpop.f32.mrf.mxu0  ;;  %6134 = vmatprep.subr.bf16.mxu0 %v6616_v33  ;;  %v6652_v33 = vld [vmem:[%s8190_s1 + $0xd68] sm:$0xff]  }
 0x186   :  { %6155 = vmatpush3.bf16.msra.mxu1 %v6615_v34  ;;  %v5842_v42 = vadd.f32 %v5841_v39, %v5840_v35  ;;  %5052 = vmatprep.mubr.bf16.mxu1 %v1274_v20  ;;  %v6651_v35 = vld [vmem:[%s8190_s1 + $0xdb0] sm:$0xff]  }
 0x187   :  { %v5863_v44 = vpop.f32.mrf.mxu1  ;;  %v5843_v45 = vpop.f32.mrf.mxu0  ;;  %6156 = vmatprep.subr.bf16.mxu1 %v6617_v36 }
 0x188   :  { %v4455_v47 = vadd.f32 %v5842_v42, %v7912_v6  ;;  %v5864_v48 = vadd.f32 %v5863_v44, %v5862_v38  ;;  %6135 = vmatpush3.bf16.msra.mxu0 %v6618_v37  ;;  %v6638_v6 = vld [vmem:[%s8190_s1 + $0xc08] sm:$0xff]   ;;  %v6656_v45 = vld [vmem:[%s8190_s1 + $0xd60] sm:$0xff]  }
 0x189   :  { %v5865_v50 = vpop.f32.mrf.mxu1  ;;  %v5844_v51 = vpop.f32.mrf.mxu0  ;;  %6136 = vmatprep.subr.bf16.mxu0 %v6620_v40  ;;  %v6653_v38 = vld [vmem:[%s8190_s1 + $0xde8] sm:$0xff]  }
 0x18a   :  { %v8013_v53 = vadd.f32 %v5864_v48, %v4455_v47  ;;  %6157 = vmatpush3.bf16.msra.mxu1 %v6619_v43  ;;  %v6654_v42 = vld [vmem:[%s8190_s1 + $0xd28] sm:$0xff]   ;;  %v6658_v50 = vld [vmem:[%s8190_s1 + $0xd20] sm:$0xff]   ;;  %v6660_v51 = vld [vmem:[%s8190_s1 + $0xd58] sm:$0xff]  }
 0x18b   :  { %v5866_v55 = vpop.f32.mrf.mxu1  ;;  %6158 = vmatprep.subr.bf16.mxu1 %v6621_v46  ;;  %v6655_v47 = vld [vmem:[%s8190_s1 + $0xda8] sm:$0xff]  }
 0x18c   :  { %6137 = vmatpush3.bf16.msra.mxu0 %v6622_v49  ;;  %v6657_v49 = vld [vmem:[%s8190_s1 + $0xde0] sm:$0xff]   ;;  %v6664_v55 = vld [vmem:[%s8190_s1 + $0xd50] sm:$0xff]  }
 0x18d   :  { %6138 = vmatprep.subr.bf16.mxu0 %v6624_v52  ;;  %v6659_v52 = vld [vmem:[%s8190_s1 + $0xda0] sm:$0xff]  }
 0x18e   :  { %6159 = vmatpush3.bf16.msra.mxu1 %v6623_v54  ;;  %v6662_v54 = vld [vmem:[%s8190_s1 + $0xd18] sm:$0xff]  }
 0x18f   :  { %6160 = vmatprep.subr.bf16.mxu1 %v6625_v56  ;;  %v6663_v56 = vld [vmem:[%s8190_s1 + $0xd98] sm:$0xff]  }
 0x190   :  { %6139 = vmatpush3.bf16.msra.mxu0 %v6626_v57  ;;  %v6665_v57 = vld [vmem:[%s8190_s1 + $0xdd0] sm:$0xff]  }
 0x191   :  { %6140 = vmatprep.subr.bf16.mxu0 %v6628_v58  ;;  %v6666_v58 = vld [vmem:[%s8190_s1 + $0xd10] sm:$0xff]  }
 0x192   :  { %6161 = vmatpush3.bf16.msra.mxu1 %v6627_v59  ;;  %v6668_v59 = vld [vmem:[%s8190_s1 + $0xd48] sm:$0xff]  }
 0x193   :  { %6162 = vmatprep.subr.bf16.mxu1 %v6629_v60  ;;  %v6667_v60 = vld [vmem:[%s8190_s1 + $0xd90] sm:$0xff]  }
 0x194   :  { %6141 = vmatpush3.bf16.msra.mxu0 %v6630_v61  ;;  %v6669_v61 = vld [vmem:[%s8190_s1 + $0xdc8] sm:$0xff]  }
 0x195   :  { %6142 = vmatprep.subr.bf16.mxu0 %v6632_v62 }
 0x196   :  { %6163 = vmatpush3.bf16.msra.mxu1 %v6631_v63 }
 0x197   :  { %6164 = vmatprep.subr.bf16.mxu1 %v6633_v0 }
 0x198   :  { %6143 = vmatpush3.bf16.msra.mxu0 %v6634_v1 }
 0x199   :  { %6144 = vmatprep.subr.bf16.mxu0 %v6636_v2 }
 0x19a   :  { %6165 = vmatpush3.bf16.msra.mxu1 %v6635_v3 }
 0x19b   :  { %6166 = vmatprep.subr.bf16.mxu1 %v6637_v4 }
 0x19c   :  { %6145 = vmatpush3.bf16.msra.mxu0 %v6638_v6 }
 0x19d   :  { %6146 = vmatprep.subr.bf16.mxu0 %v6640_v9 }
 0x19e   :  { %6167 = vmatpush3.bf16.msra.mxu1 %v6639_v10 }
 0x19f   :  { %6168 = vmatprep.subr.bf16.mxu1 %v6641_v13 }
 0x1a0   :  { %6147 = vmatpush3.bf16.msra.mxu0 %v6642_v14 }
 0x1a1   :  { %6176 = vmatprep.subr.bf16.mxu0 %v6644_v18 }
 0x1a2   :  { %6169 = vmatpush3.bf16.msra.mxu1 %v6643_v19 }
 0x1a3   :  { %v5884_v28 = vpop.f32.mrf.mxu0  ;;  %5013 = vmatmul.mubr.bf16.vlgmr.msra.gmra.mxu0 %v1250_v17  ;;  %6198 = vmatprep.subr.bf16.mxu1 %v6645_v22 }
 0x1a4   :  { %6177 = vmatpush3.bf16.msra.mxu0 %v6646_v23  ;;  %5092 = vmatprep.mubr.bf16.mxu0 %v1271_v21 }
 0x1a5   :  { %v5906_v31 = vpop.f32.mrf.mxu1  ;;  %5053 = vmatmul.mubr.bf16.vlgmr.msra.gmra.mxu1 %v1272_v24  ;;  %v5885_v32 = vpop.f32.mrf.mxu0  ;;  %6178 = vmatprep.subr.bf16.mxu0 %v6648_v25 }
 0x1a6   :  { %6199 = vmatpush3.bf16.msra.mxu1 %v6647_v26  ;;  %v5886_v34 = vadd.f32 %v5885_v32, %v5884_v28  ;;  %5132 = vmatprep.mubr.bf16.mxu1 %v1275_v27 }
 0x1a7   :  { %v5907_v36 = vpop.f32.mrf.mxu1  ;;  %v5887_v37 = vpop.f32.mrf.mxu0  ;;  %6200 = vmatprep.subr.bf16.mxu1 %v6649_v29 }
 0x1a8   :  { %v4535_v39 = vadd.f32 %v5886_v34, %v8013_v53  ;;  %v5908_v40 = vadd.f32 %v5907_v36, %v5906_v31  ;;  %6179 = vmatpush3.bf16.msra.mxu0 %v6650_v30  ;;  %v6661_v53 = vld [vmem:[%s8190_s1 + $0xdd8] sm:$0xff]  }
 0x1a9   :  { %v5909_v43 = vpop.f32.mrf.mxu1  ;;  %v5888_v44 = vpop.f32.mrf.mxu0  ;;  %6180 = vmatprep.subr.bf16.mxu0 %v6652_v33 }
 0x1aa   :  { %v4575_v46 = vadd.f32 %v5908_v40, %v4535_v39  ;;  %6201 = vmatpush3.bf16.msra.mxu1 %v6651_v35 }
 0x1ab   :  { %v5910_v48 = vpop.f32.mrf.mxu1  ;;  %6202 = vmatprep.subr.bf16.mxu1 %v6653_v38 }
 0x1ac   :  { %6181 = vmatpush3.bf16.msra.mxu0 %v6654_v42 }
 0x1ad   :  { %6182 = vmatprep.subr.bf16.mxu0 %v6656_v45 }
 0x1ae   :  { %6203 = vmatpush3.bf16.msra.mxu1 %v6655_v47 }
 0x1af   :  { %6204 = vmatprep.subr.bf16.mxu1 %v6657_v49 }
 0x1b0   :  { %6183 = vmatpush3.bf16.msra.mxu0 %v6658_v50 }
 0x1b1   :  { %6184 = vmatprep.subr.bf16.mxu0 %v6660_v51 }
 0x1b2   :  { %6205 = vmatpush3.bf16.msra.mxu1 %v6659_v52 }
 0x1b3   :  { %6206 = vmatprep.subr.bf16.mxu1 %v6661_v53 }
 0x1b4   :  { %6185 = vmatpush3.bf16.msra.mxu0 %v6662_v54 }
 0x1b5   :  { %6186 = vmatprep.subr.bf16.mxu0 %v6664_v55 }
 0x1b6   :  { %6207 = vmatpush3.bf16.msra.mxu1 %v6663_v56 }
 0x1b7   :  { %6208 = vmatprep.subr.bf16.mxu1 %v6665_v57 }
 0x1b8   :  { %8 = vsyncpa [#allocation3], 0  ;;  %6187 = vmatpush3.bf16.msra.mxu0 %v6666_v58  ;;  %v6670_v62 = vld [vmem:[%s8190_s1 + $0xd08] sm:$0xff]   ;;  %v6672_v63 = vld [vmem:[%s8190_s1 + $0xd40] sm:$0xff]   ;;  %v1257_v3 = vrot.slane %v8071_v12, %v6826_v41 }
 0x1b9   :  { %6188 = vmatprep.subr.bf16.mxu0 %v6668_v59  ;;  %v6671_v0 = vld [vmem:[%s8190_s1 + $0xd88] sm:$0xff]   ;;  %v6673_v1 = vld [vmem:[%s8190_s1 + $0xdc0] sm:$0xff]  }
 0x1ba   :  { %6209 = vmatpush3.bf16.msra.mxu1 %v6667_v60  ;;  %v6674_v2 = vld [vmem:[%s8190_s1 + $0xd00] sm:$0xff]   ;;  %v1273_v5 = vcombine.high %v1257_v3, %v1257_v3 }
 0x1bb   :  { %6210 = vmatprep.subr.bf16.mxu1 %v6669_v61  ;;  %v6675_v4 = vld [vmem:[%s8190_s1 + $0xd80] sm:$0xff]   ;;  %s6700_s1 = smov [#allocation2]  }
 0x1bc   :  { %6189 = vmatpush3.bf16.msra.mxu0 %v6670_v62  ;;  %s5147_s14 = sshll.u32 %s6700_s1, 4  ;;  %s5148_s14 = int_to_ptr.vmem [resolvable:$true] %s5147_s14 }
 0x1bd   :  { %6190 = vmatprep.subr.bf16.mxu0 %v6672_v63  ;;  %s6677_s15 = scalar_lea.vmem %s5148_s14, 32  ;;  %p6682_p1 = scmp.lt.s32.totalorder %s5148_s14, %s5148_s14 }
 0x1be   :  { %6211 = vmatpush3.bf16.msra.mxu1 %v6671_v0  ;;  %p6678_p0 = scmp.ne.s32.totalorder %s5148_s14, %s6677_s15  ;;  %p6683_p2 = scmp.lt.s32.totalorder %s6677_s15, %s6677_s15 }
 0x1bf   :  { %6212 = vmatprep.subr.bf16.mxu1 %v6673_v1 }
 0x1c0   :  { %6191 = vmatpush3.bf16.msra.mxu0 %v6674_v2  ;;  %p6684_p3 = por %p6683_p2, %p6682_p1 }
 0x1c2   :  { %6213 = vmatpush3.bf16.msra.mxu1 %v6675_v4  ;;  %p6685_p4 = pnand %p6684_p3, %p6678_p0 }
 0x1c3   :  { %v5928_v6 = vpop.f32.mrf.mxu0  ;;  %5093 = vmatmul.mubr.bf16.vlgmr.msra.gmra.mxu0 %v1257_v3 }
 0x1c5   :  { %v5950_v7 = vpop.f32.mrf.mxu1  ;;  %5133 = vmatmul.mubr.bf16.vlgmr.msra.gmra.mxu1 %v1273_v5  ;;  %v5929_v8 = vpop.f32.mrf.mxu0 }
 0x1c6   :  { %v5930_v9 = vadd.f32 %v5929_v8, %v5928_v6 }
 0x1c7   :  { %v5951_v10 = vpop.f32.mrf.mxu1  ;;  %v5931_v11 = vpop.f32.mrf.mxu0 }
 0x1c8   :  { %v4615_v13 = vadd.f32 %v5930_v9, %v4575_v46  ;;  %v5952_v14 = vadd.f32 %v5951_v10, %v5950_v7 }
 0x1c9   :  { %v5953_v41 = vpop.f32.mrf.mxu1  ;;  %v5932_v12 = vpop.f32.mrf.mxu0 }
 0x1ca   :  { %v4655_v15 = vadd.f32 %v5952_v14, %v4615_v13 }
 0x1cb   :  { %v5954_v16 = vpop.f32.mrf.mxu1 }
 0x1e3   :  { %v5972_v17 = vpop.f32.mrf.mxu0 }
 0x1e5   :  { %v5994_v18 = vpop.f32.mrf.mxu1  ;;  %v5973_v19 = vpop.f32.mrf.mxu0 }
 0x1e6   :  { %v5974_v20 = vadd.f32 %v5973_v19, %v5972_v17 }
 0x1e7   :  { %v5995_v21 = vpop.f32.mrf.mxu1  ;;  %v5975_v22 = vpop.f32.mrf.mxu0 }
 0x1e8   :  { %v4695_v23 = vadd.f32 %v5974_v20, %v4655_v15  ;;  %v5996_v24 = vadd.f32 %v5995_v21, %v5994_v18 }
 0x1e9   :  { %v5997_v25 = vpop.f32.mrf.mxu1  ;;  %v5976_v26 = vpop.f32.mrf.mxu0 }
 0x1ea   :  { %v4735_v27 = vadd.f32 %v5996_v24, %v4695_v23 }
 0x1eb   :  { %v5998_v28 = vpop.f32.mrf.mxu1 }
 0x203   :  { %v6016_v29 = vpop.f32.mrf.mxu0 }
 0x205   :  { %v6038_v30 = vpop.f32.mrf.mxu1  ;;  %v6017_v31 = vpop.f32.mrf.mxu0 }
 0x206   :  { %v6018_v32 = vadd.f32 %v6017_v31, %v6016_v29 }
 0x207   :  { %v6039_v33 = vpop.f32.mrf.mxu1  ;;  %v6019_v34 = vpop.f32.mrf.mxu0 }
 0x208   :  { %v4775_v35 = vadd.f32 %v6018_v32, %v4735_v27  ;;  %v6040_v36 = vadd.f32 %v6039_v33, %v6038_v30 }
 0x209   :  { %v6041_v37 = vpop.f32.mrf.mxu1  ;;  %v6020_v38 = vpop.f32.mrf.mxu0 }
 0x20a   :  { %v4815_v39 = vadd.f32 %v6040_v36, %v4775_v35 }
 0x20b   :  { %v6042_v40 = vpop.f32.mrf.mxu1 }
 0x223   :  { %v6060_v42 = vpop.f32.mrf.mxu0 }
 0x225   :  { %v6082_v43 = vpop.f32.mrf.mxu1  ;;  %v6061_v44 = vpop.f32.mrf.mxu0 }
 0x226   :  { %v6062_v45 = vadd.f32 %v6061_v44, %v6060_v42 }
 0x227   :  { %v6083_v46 = vpop.f32.mrf.mxu1  ;;  %v6063_v47 = vpop.f32.mrf.mxu0 }
 0x228   :  { %v4855_v48 = vadd.f32 %v6062_v45, %v4815_v39  ;;  %v6084_v49 = vadd.f32 %v6083_v46, %v6082_v43 }
 0x229   :  { %v6085_v50 = vpop.f32.mrf.mxu1  ;;  %v6064_v51 = vpop.f32.mrf.mxu0 }
 0x22a   :  { %v4895_v52 = vadd.f32 %v6084_v49, %v4855_v48 }
 0x22b   :  { %v6086_v53 = vpop.f32.mrf.mxu1 }
 0x243   :  { %v6104_v54 = vpop.f32.mrf.mxu0 }
 0x245   :  { %v6126_v55 = vpop.f32.mrf.mxu1  ;;  %v6105_v56 = vpop.f32.mrf.mxu0 }
 0x246   :  { %v6106_v6 = vadd.f32 %v6105_v56, %v6104_v54 }
 0x247   :  { %v6127_v57 = vpop.f32.mrf.mxu1  ;;  %v6107_v58 = vpop.f32.mrf.mxu0 }
 0x248   :  { %v4935_v7 = vadd.f32 %v6106_v6, %v4895_v52  ;;  %v6128_v8 = vadd.f32 %v6127_v57, %v6126_v55 }
 0x249   :  { %v6129_v59 = vpop.f32.mrf.mxu1  ;;  %v6108_v60 = vpop.f32.mrf.mxu0 }
 0x24a   :  { %v4975_v10 = vadd.f32 %v6128_v8, %v4935_v7 }
 0x24b   :  { %v6130_v61 = vpop.f32.mrf.mxu1 }
 0x263   :  { %v6148_v62 = vpop.f32.mrf.mxu0 }
 0x265   :  { %v6170_v63 = vpop.f32.mrf.mxu1  ;;  %v6149_v0 = vpop.f32.mrf.mxu0 }
 0x266   :  { %v6150_v9 = vadd.f32 %v6149_v0, %v6148_v62 }
 0x267   :  { %v6171_v1 = vpop.f32.mrf.mxu1  ;;  %v6151_v2 = vpop.f32.mrf.mxu0 }
 0x268   :  { %v5015_v11 = vadd.f32 %v6150_v9, %v4975_v10  ;;  %v6172_v13 = vadd.f32 %v6171_v1, %v6170_v63 }
 0x269   :  { %v6173_v3 = vpop.f32.mrf.mxu1  ;;  %v6152_v4 = vpop.f32.mrf.mxu0 }
 0x26a   :  { %v5055_v15 = vadd.f32 %v6172_v13, %v5015_v11 }
 0x26b   :  { %v6174_v5 = vpop.f32.mrf.mxu1 }
 0x283   :  { %v6192_v14 = vpop.f32.mrf.mxu0 }
 0x285   :  { %v6214_v41 = vpop.f32.mrf.mxu1  ;;  %v6193_v12 = vpop.f32.mrf.mxu0 }
 0x286   :  { %v6194_v16 = vadd.f32 %v6193_v12, %v6192_v14 }
 0x287   :  { %v6215_v17 = vpop.f32.mrf.mxu1  ;;  %v6195_v18 = vpop.f32.mrf.mxu0 }
 0x288   :  { %v5095_v19 = vadd.f32 %v6194_v16, %v5055_v15  ;;  %v6216_v20 = vadd.f32 %v6215_v17, %v6214_v41 }
 0x289   :  { %v6217_v21 = vpop.f32.mrf.mxu1  ;;  %v6196_v22 = vpop.f32.mrf.mxu0 }
 0x28a   :  { %v5135_v23 = vadd.f32 %v6216_v20, %v5095_v19 }
 0x28b   :  { %v6218_v24 = vpop.f32.mrf.mxu1 }
 0x28c   :  { %5140 = vst [vmem:[#allocation2] sm:$0x3] %v5135_v23 }
 0x28d   :  { %6688 = shalt.err (!%p6685_p4)
}
 0x28e   :  { %5150 = dma.vmem_to_hbm [thread:$0]  %s5148_s14, 32, %s8192_s3, [#allocation3]  }
 0x28f   :  { %6697 = dma.done.wait [#allocation3], 32  }
 0x290   :  { %6698 = vsyncadd [#allocation3], 4294967264 }
 0x291   :  { %5154 = vsyncpa [#allocation3], 1 }

</bundles_post_ra>
